<compile_context>
chip_gen: v5e
topology: v5e:2x2
jax: 0.10.0
libtpu: 0.0.40
codegen_flags: <defaults>
</compile_context>

<pallas_src>
import jax
import jax.numpy as jnp
from jax.experimental import pallas as pl
from jax.experimental.pallas import tpu as pltpu
import numpy as np


def discriminator_kernel(seq_ref,   # (B, T)    normalized [x | y] sequence
                         w_ref,     # (2H, 8H)  fused wavefront recurrent weights
                         aux_ref,   # (8, 8H)   packed small vectors
                         out_ref):  # (B, 1)    sigmoid output
    seq = seq_ref[...]                              # (B, T)
    B, T = seq.shape
    H = w_ref.shape[1] // 8
    H2, H3, H4, H6 = 2 * H, 3 * H, 4 * H, 6 * H

    # --- weights (loaded once, outside the recurrence) -----------------------
    w_big = w_ref[...]                              # (2H, 8H)  [h0 rows ; h1 rows]
    aux = aux_ref[...]                              # (8, 8H)
    wih0_big = aux[0:1, :]                          # (1, 8H) layer-0 input w, layer-1 slots 0
    bias_big = aux[1:2, :]                          # (1, 8H) b0 in layer-0 slots, b1 in layer-1
    wih0_p = aux[2:3, :H4]                          # (1, 4H) prologue, gate order [i,f,o,g]
    b0_p = aux[3:4, :H4]                            # (1, 4H)
    wfc = aux[4:5, :H]                              # (1, H)
    bfc = aux[5:6, 0:1]                             # (1, 1)

    # --- hoisted additive terms for every wavefront step ---------------------
    # step t needs x_{t+1}*W_ih0 + b0 (layer-0 slots) and b1 (layer-1 slots).
    x_shift = jnp.concatenate([seq[:, 1:], jnp.zeros((B, 1), jnp.float32)], axis=1)
    add_all = x_shift[:, :, None] * wih0_big[None, :, :] + bias_big[None, :, :]  # (B,T,8H)

    # --- prologue: layer-0 cell at t=0 with zero state (c = i*g, h = o*tanh c)
    g0 = seq[:, 0:1] * wih0_p + b0_p                # (B, 4H)
    a0 = jax.nn.sigmoid(g0[:, :H3])                 # [i, f, o]
    gg0 = jnp.tanh(g0[:, H3:])
    c0 = a0[:, :H] * gg0
    h0 = a0[:, H2:H3] * jnp.tanh(c0)
    zeros_h = jnp.zeros((B, H), jnp.float32)
    h_cat = jnp.concatenate([h0, zeros_h], axis=1)  # [h0(0) | h1(-1)=0]
    c_cat = jnp.concatenate([c0, zeros_h], axis=1)  # [c0(0) | c1(-1)=0]

    # --- fully unrolled wavefront recurrence ----------------------------------
    # combined gate layout: [i0, i1, f0, f1, o0, o1, g0, g1]  (each H lanes)
    # step t: one matmul produces gates for layer-0@t+1 and layer-1@t; the
    # combined cell yields h_cat = [h0(t+1) | h1(t)] which is exactly the
    # input ordering the next matmul needs.  Last step's layer-0 half is
    # harmless garbage (finite), only h1(T-1) is consumed.
    for t in range(T):
        gates = jnp.dot(h_cat, w_big, preferred_element_type=jnp.float32) \
            + add_all[:, t, :]                       # (B, 8H)
        act = jax.nn.sigmoid(gates[:, :H6])          # one EUP push: i0,i1,f0,f1,o0,o1
        g = jnp.tanh(gates[:, H6:])                  # one EUP push: g0,g1
        c_cat = act[:, H2:H4] * c_cat + act[:, :H2] * g
        h_cat = act[:, H4:H6] * jnp.tanh(c_cat)      # one EUP push for both cell states

    # --- final Linear(H -> 1) + Sigmoid as VPU mul + lane reduce --------------
    h1 = h_cat[:, H:H2]                              # h1(T-1)
    logits = jnp.sum(h1 * wfc, axis=-1, keepdims=True) + bfc
    out_ref[...] = jax.nn.sigmoid(logits).astype(out_ref.dtype)


class DiscriminatorPallas:
    """Deterministically-initialized Pallas version of Discriminator (LSTM cell)."""

    def __init__(self, condition_size, dis_hidden_size, hidden_layer_depth=2,
                 mean=0.0, std=1.0, key=jax.random.PRNGKey(0)):
        assert hidden_layer_depth == 2, "kernel implements the default 2-layer LSTM"
        self.condition_size = condition_size
        self.H = dis_hidden_size
        self.mean = float(mean)
        self.std = float(std)

        H = dis_hidden_size
        ks = jax.random.split(key, 10)
        scale = 0.1

        def rnd(k, shape):
            return (scale * jax.random.normal(k, shape)).astype(jnp.float32)

        # PyTorch LSTM parameter shapes (gate order [i, f, g, o] along the 4H axis)
        self.wih0 = rnd(ks[0], (4 * H, 1))
        self.whh0 = rnd(ks[1], (4 * H, H))
        self.b0 = rnd(ks[2], (4 * H,)) + rnd(ks[3], (4 * H,))     # b_ih_l0 + b_hh_l0
        self.wih1 = rnd(ks[4], (4 * H, H))
        self.whh1 = rnd(ks[5], (4 * H, H))
        self.b1 = rnd(ks[6], (4 * H,)) + rnd(ks[7], (4 * H,))     # b_ih_l1 + b_hh_l1
        # nn.Linear(H, 1)
        self.wfc = rnd(ks[8], (1, H))
        self.bfc = rnd(ks[9], (1,))

        # ---- pack / permute weights once (wrapper-side, free) ----------------
        def blk(a):   # split the 4H (last) axis into PyTorch gate blocks i, f, g, o
            return a[..., :H], a[..., H:2 * H], a[..., 2 * H:3 * H], a[..., 3 * H:4 * H]

        # combined column layout: [i0, i1, f0, f1, o0, o1, g0, g1]
        i0, f0, g0, o0 = blk(self.whh0.T)       # (H, H) each: h0 -> layer-0 gates
        i1, f1, g1, o1 = blk(self.wih1.T)       # (H, H) each: h0 -> layer-1 gates
        ri, rf, rg, ro = blk(self.whh1.T)       # (H, H) each: h1 -> layer-1 gates
        Z = jnp.zeros((H, H), jnp.float32)
        top = jnp.concatenate([i0, i1, f0, f1, o0, o1, g0, g1], axis=1)
        bot = jnp.concatenate([Z, ri, Z, rf, Z, ro, Z, rg], axis=1)
        self._w_big = jnp.concatenate([top, bot], axis=0).astype(jnp.float32)  # (2H, 8H)

        w0i, w0f, w0g, w0o = blk(self.wih0.reshape(4 * H))
        b0i, b0f, b0g, b0o = blk(self.b0)
        b1i, b1f, b1g, b1o = blk(self.b1)
        zH = jnp.zeros((H,), jnp.float32)
        wih0_big = jnp.concatenate([w0i, zH, w0f, zH, w0o, zH, w0g, zH])
        bias_big = jnp.concatenate([b0i, b1i, b0f, b1f, b0o, b1o, b0g, b1g])
        wih0_p = jnp.concatenate([w0i, w0f, w0o, w0g])       # prologue [i,f,o,g]
        b0_p = jnp.concatenate([b0i, b0f, b0o, b0g])

        aux = jnp.zeros((8, 8 * H), jnp.float32)
        aux = aux.at[0].set(wih0_big)
        aux = aux.at[1].set(bias_big)
        aux = aux.at[2, :4 * H].set(wih0_p)
        aux = aux.at[3, :4 * H].set(b0_p)
        aux = aux.at[4, :H].set(self.wfc.reshape(H))
        aux = aux.at[5, 0].set(self.bfc[0])
        self._aux = aux

    def __call__(self, y, x):
        B = x.shape[0]

        # glue: concat + normalize -> (B, T)
        seq = jnp.concatenate([x, y.reshape(-1, 1)], axis=1).astype(jnp.float32)
        seq = (seq - self.mean) / self.std

        # pad batch to a multiple of 8 so every (B, *) vreg uses all sublanes
        B_pad = ((B + 7) // 8) * 8
        if B_pad != B:
            seq = jnp.pad(seq, ((0, B_pad - B), (0, 0)))

        vmem = pl.BlockSpec(memory_space=pltpu.MemorySpace.VMEM)
        out = pl.pallas_call(
            discriminator_kernel,
            out_shape=jax.ShapeDtypeStruct((B_pad, 1), jnp.float32),
            # grid=() keeps everything resident; total footprint is <200 KB so it
            # fits VMEM on v5e/v6e/v7x.  For large batches, tile B with a
            # "parallel" grid axis instead (uses v7x's second TensorCore).
            in_specs=[vmem, vmem, vmem],
            out_specs=vmem,
        )(seq, self._w_big, self._aux)
        return out[:B]

    # pure-JAX reference (original math/gate-order, no Pallas) for validation
    def reference(self, y, x):
        B = x.shape[0]
        T = self.condition_size + 1
        H = self.H
        seq = jnp.concatenate([x, y.reshape(-1, 1)], axis=1).astype(jnp.float32)
        seq = (seq - self.mean) / self.std

        def cell(gates, c):
            i = jax.nn.sigmoid(gates[:, :H])
            f = jax.nn.sigmoid(gates[:, H:2 * H])
            g = jnp.tanh(gates[:, 2 * H:3 * H])
            o = jax.nn.sigmoid(gates[:, 3 * H:])
            c = f * c + i * g
            return o * jnp.tanh(c), c

        h0 = c0 = h1 = c1 = jnp.zeros((B, H), jnp.float32)
        for t in range(T):
            x_t = seq[:, t:t + 1]
            g0 = x_t @ self.wih0.T + h0 @ self.whh0.T + self.b0
            h0, c0 = cell(g0, c0)
            g1 = h0 @ self.wih1.T + h1 @ self.whh1.T + self.b1
            h1, c1 = cell(g1, c1)
        return jax.nn.sigmoid(h1 @ self.wfc.T + self.bfc.reshape(1, 1))


if __name__ == "__main__":
    key = jax.random.PRNGKey(0)
    k_param, k_y, k_x = jax.random.split(key, 3)

    B = 4
    condition_size = 7          # sequence length T = 8
    H = 32                      # dis_hidden_size -> 4H = 128 (lane-aligned)

    disc = DiscriminatorPallas(condition_size, H, key=k_param)

    y = jax.random.normal(k_y, (B, 1), dtype=jnp.float32)
    x = jax.random.normal(k_x, (B, condition_size), dtype=jnp.float32)

    out = disc(y, x)
    out = jax.block_until_ready(out)

    ref = disc.reference(y, x)
    np.testing.assert_allclose(np.asarray(out), np.asarray(ref), rtol=1e-4, atol=1e-5)
    assert out.shape == (B, 1)

    print("KERNEL_OK")
</pallas_src>

<mosaic_0001>
module attributes {stable_mosaic.version = 11 : i64} {
  func.func @discriminator_kernel(%arg0: memref<8x8xf32, #tpu.memory_space<vmem>>, %arg1: memref<64x256xf32, #tpu.memory_space<vmem>>, %arg2: memref<8x256xf32, #tpu.memory_space<vmem>>, %arg3: memref<8x1xf32, #tpu.memory_space<vmem>>) attributes {dimension_semantics = [], scalar_prefetch = 0 : i64, scratch_operands = 0 : i64, tpu.core_type = #tpu.core_type<tc>} {
    %c0 = arith.constant 0 : index
    %c0_0 = arith.constant 0 : index
    %0 = vector.load %arg0[%c0, %c0_0] : memref<8x8xf32, #tpu.memory_space<vmem>>, vector<8x8xf32>
    %c0_1 = arith.constant 0 : index
    %c0_2 = arith.constant 0 : index
    %1 = vector.load %arg1[%c0_1, %c0_2] : memref<64x256xf32, #tpu.memory_space<vmem>>, vector<64x256xf32>
    %c0_3 = arith.constant 0 : index
    %c0_4 = arith.constant 0 : index
    %2 = vector.load %arg2[%c0_3, %c0_4] : memref<8x256xf32, #tpu.memory_space<vmem>>, vector<8x256xf32>
    %3 = vector.extract_strided_slice %2 {offsets = [0, 0], sizes = [1, 256], strides = [1, 1]} : vector<8x256xf32> to vector<1x256xf32>
    %4 = vector.extract_strided_slice %2 {offsets = [1, 0], sizes = [1, 256], strides = [1, 1]} : vector<8x256xf32> to vector<1x256xf32>
    %5 = vector.extract_strided_slice %2 {offsets = [2, 0], sizes = [1, 128], strides = [1, 1]} : vector<8x256xf32> to vector<1x128xf32>
    %6 = vector.extract_strided_slice %2 {offsets = [3, 0], sizes = [1, 128], strides = [1, 1]} : vector<8x256xf32> to vector<1x128xf32>
    %7 = vector.extract_strided_slice %2 {offsets = [4, 0], sizes = [1, 32], strides = [1, 1]} : vector<8x256xf32> to vector<1x32xf32>
    %8 = vector.extract_strided_slice %2 {offsets = [5, 0], sizes = [1, 1], strides = [1, 1]} : vector<8x256xf32> to vector<1x1xf32>
    %9 = vector.extract_strided_slice %0 {offsets = [0, 1], sizes = [8, 7], strides = [1, 1]} : vector<8x8xf32> to vector<8x7xf32>
    %cst = arith.constant 0.000000e+00 : f32
    %10 = vector.broadcast %cst : f32 to vector<8x1xf32>
    %11 = tpu.concatenate %9, %10 in 1 : vector<8x7xf32>, vector<8x1xf32> -> vector<8x8xf32>
    %12 = vector.shape_cast %11 : vector<8x8xf32> to vector<8x8x1xf32>
    %13 = vector.shape_cast %3 : vector<1x256xf32> to vector<1x1x256xf32>
    %14 = vector.broadcast %12 : vector<8x8x1xf32> to vector<8x8x256xf32>
    %15 = vector.broadcast %13 : vector<1x1x256xf32> to vector<8x8x256xf32>
    %16 = arith.mulf %14, %15 : vector<8x8x256xf32>
    %17 = vector.shape_cast %4 : vector<1x256xf32> to vector<1x1x256xf32>
    %18 = vector.broadcast %17 : vector<1x1x256xf32> to vector<8x8x256xf32>
    %19 = arith.addf %16, %18 : vector<8x8x256xf32>
    %20 = vector.extract_strided_slice %0 {offsets = [0, 0], sizes = [8, 1], strides = [1, 1]} : vector<8x8xf32> to vector<8x1xf32>
    %21 = vector.broadcast %20 : vector<8x1xf32> to vector<8x128xf32>
    %22 = vector.broadcast %5 : vector<1x128xf32> to vector<8x128xf32>
    %23 = arith.mulf %21, %22 : vector<8x128xf32>
    %24 = vector.broadcast %6 : vector<1x128xf32> to vector<8x128xf32>
    %25 = arith.addf %23, %24 : vector<8x128xf32>
    %26 = vector.extract_strided_slice %25 {offsets = [0, 0], sizes = [8, 96], strides = [1, 1]} : vector<8x128xf32> to vector<8x96xf32>
    %27 = arith.negf %26 : vector<8x96xf32>
    %28 = math.exp %27 : vector<8x96xf32>
    %cst_5 = arith.constant 1.000000e+00 : f32
    %29 = vector.broadcast %cst_5 : f32 to vector<8x96xf32>
    %30 = arith.addf %29, %28 : vector<8x96xf32>
    %31 = arith.divf %29, %30 : vector<8x96xf32>
    %32 = vector.extract_strided_slice %25 {offsets = [0, 96], sizes = [8, 32], strides = [1, 1]} : vector<8x128xf32> to vector<8x32xf32>
    %33 = math.tanh %32 : vector<8x32xf32>
    %34 = vector.extract_strided_slice %31 {offsets = [0, 0], sizes = [8, 32], strides = [1, 1]} : vector<8x96xf32> to vector<8x32xf32>
    %35 = arith.mulf %34, %33 : vector<8x32xf32>
    %36 = vector.extract_strided_slice %31 {offsets = [0, 64], sizes = [8, 32], strides = [1, 1]} : vector<8x96xf32> to vector<8x32xf32>
    %37 = math.tanh %35 : vector<8x32xf32>
    %38 = arith.mulf %36, %37 : vector<8x32xf32>
    %cst_6 = arith.constant 0.000000e+00 : f32
    %39 = vector.broadcast %cst_6 : f32 to vector<8x32xf32>
    %40 = tpu.concatenate %38, %39 in 1 : vector<8x32xf32>, vector<8x32xf32> -> vector<8x64xf32>
    %41 = tpu.concatenate %35, %39 in 1 : vector<8x32xf32>, vector<8x32xf32> -> vector<8x64xf32>
    %cst_7 = arith.constant dense<0.000000e+00> : vector<8x256xf32>
    %42 = tpu.matmul %40, %1, %cst_7 {dimension_numbers = #tpu.dot_dimension_numbers<[1], [0], [0], [1], [0, 0, 1, 1], [], []>} : vector<8x64xf32>, vector<64x256xf32>, vector<8x256xf32> -> vector<8x256xf32>
    %43 = vector.extract_strided_slice %19 {offsets = [0, 0, 0], sizes = [8, 1, 256], strides = [1, 1, 1]} : vector<8x8x256xf32> to vector<8x1x256xf32>
    %44 = vector.shape_cast %43 : vector<8x1x256xf32> to vector<8x256xf32>
    %45 = arith.addf %42, %44 : vector<8x256xf32>
    %46 = vector.extract_strided_slice %45 {offsets = [0, 0], sizes = [8, 192], strides = [1, 1]} : vector<8x256xf32> to vector<8x192xf32>
    %47 = arith.negf %46 : vector<8x192xf32>
    %48 = math.exp %47 : vector<8x192xf32>
    %cst_8 = arith.constant 1.000000e+00 : f32
    %49 = vector.broadcast %cst_8 : f32 to vector<8x192xf32>
    %50 = arith.addf %49, %48 : vector<8x192xf32>
    %51 = arith.divf %49, %50 : vector<8x192xf32>
    %52 = vector.extract_strided_slice %45 {offsets = [0, 192], sizes = [8, 64], strides = [1, 1]} : vector<8x256xf32> to vector<8x64xf32>
    %53 = math.tanh %52 : vector<8x64xf32>
    %54 = vector.extract_strided_slice %51 {offsets = [0, 64], sizes = [8, 64], strides = [1, 1]} : vector<8x192xf32> to vector<8x64xf32>
    %55 = arith.mulf %54, %41 : vector<8x64xf32>
    %56 = vector.extract_strided_slice %51 {offsets = [0, 0], sizes = [8, 64], strides = [1, 1]} : vector<8x192xf32> to vector<8x64xf32>
    %57 = arith.mulf %56, %53 : vector<8x64xf32>
    %58 = arith.addf %55, %57 : vector<8x64xf32>
    %59 = vector.extract_strided_slice %51 {offsets = [0, 128], sizes = [8, 64], strides = [1, 1]} : vector<8x192xf32> to vector<8x64xf32>
    %60 = math.tanh %58 : vector<8x64xf32>
    %61 = arith.mulf %59, %60 : vector<8x64xf32>
    %cst_9 = arith.constant dense<0.000000e+00> : vector<8x256xf32>
    %62 = tpu.matmul %61, %1, %cst_9 {dimension_numbers = #tpu.dot_dimension_numbers<[1], [0], [0], [1], [0, 0, 1, 1], [], []>} : vector<8x64xf32>, vector<64x256xf32>, vector<8x256xf32> -> vector<8x256xf32>
    %63 = vector.extract_strided_slice %19 {offsets = [0, 1, 0], sizes = [8, 1, 256], strides = [1, 1, 1]} : vector<8x8x256xf32> to vector<8x1x256xf32>
    %64 = vector.shape_cast %63 : vector<8x1x256xf32> to vector<8x256xf32>
    %65 = arith.addf %62, %64 : vector<8x256xf32>
    %66 = vector.extract_strided_slice %65 {offsets = [0, 0], sizes = [8, 192], strides = [1, 1]} : vector<8x256xf32> to vector<8x192xf32>
    %67 = arith.negf %66 : vector<8x192xf32>
    %68 = math.exp %67 : vector<8x192xf32>
    %cst_10 = arith.constant 1.000000e+00 : f32
    %69 = vector.broadcast %cst_10 : f32 to vector<8x192xf32>
    %70 = arith.addf %69, %68 : vector<8x192xf32>
    %71 = arith.divf %69, %70 : vector<8x192xf32>
    %72 = vector.extract_strided_slice %65 {offsets = [0, 192], sizes = [8, 64], strides = [1, 1]} : vector<8x256xf32> to vector<8x64xf32>
    %73 = math.tanh %72 : vector<8x64xf32>
    %74 = vector.extract_strided_slice %71 {offsets = [0, 64], sizes = [8, 64], strides = [1, 1]} : vector<8x192xf32> to vector<8x64xf32>
    %75 = arith.mulf %74, %58 : vector<8x64xf32>
    %76 = vector.extract_strided_slice %71 {offsets = [0, 0], sizes = [8, 64], strides = [1, 1]} : vector<8x192xf32> to vector<8x64xf32>
    %77 = arith.mulf %76, %73 : vector<8x64xf32>
    %78 = arith.addf %75, %77 : vector<8x64xf32>
    %79 = vector.extract_strided_slice %71 {offsets = [0, 128], sizes = [8, 64], strides = [1, 1]} : vector<8x192xf32> to vector<8x64xf32>
    %80 = math.tanh %78 : vector<8x64xf32>
    %81 = arith.mulf %79, %80 : vector<8x64xf32>
    %cst_11 = arith.constant dense<0.000000e+00> : vector<8x256xf32>
    %82 = tpu.matmul %81, %1, %cst_11 {dimension_numbers = #tpu.dot_dimension_numbers<[1], [0], [0], [1], [0, 0, 1, 1], [], []>} : vector<8x64xf32>, vector<64x256xf32>, vector<8x256xf32> -> vector<8x256xf32>
    %83 = vector.extract_strided_slice %19 {offsets = [0, 2, 0], sizes = [8, 1, 256], strides = [1, 1, 1]} : vector<8x8x256xf32> to vector<8x1x256xf32>
    %84 = vector.shape_cast %83 : vector<8x1x256xf32> to vector<8x256xf32>
    %85 = arith.addf %82, %84 : vector<8x256xf32>
    %86 = vector.extract_strided_slice %85 {offsets = [0, 0], sizes = [8, 192], strides = [1, 1]} : vector<8x256xf32> to vector<8x192xf32>
    %87 = arith.negf %86 : vector<8x192xf32>
    %88 = math.exp %87 : vector<8x192xf32>
    %cst_12 = arith.constant 1.000000e+00 : f32
    %89 = vector.broadcast %cst_12 : f32 to vector<8x192xf32>
    %90 = arith.addf %89, %88 : vector<8x192xf32>
    %91 = arith.divf %89, %90 : vector<8x192xf32>
    %92 = vector.extract_strided_slice %85 {offsets = [0, 192], sizes = [8, 64], strides = [1, 1]} : vector<8x256xf32> to vector<8x64xf32>
    %93 = math.tanh %92 : vector<8x64xf32>
    %94 = vector.extract_strided_slice %91 {offsets = [0, 64], sizes = [8, 64], strides = [1, 1]} : vector<8x192xf32> to vector<8x64xf32>
    %95 = arith.mulf %94, %78 : vector<8x64xf32>
    %96 = vector.extract_strided_slice %91 {offsets = [0, 0], sizes = [8, 64], strides = [1, 1]} : vector<8x192xf32> to vector<8x64xf32>
    %97 = arith.mulf %96, %93 : vector<8x64xf32>
    %98 = arith.addf %95, %97 : vector<8x64xf32>
    %99 = vector.extract_strided_slice %91 {offsets = [0, 128], sizes = [8, 64], strides = [1, 1]} : vector<8x192xf32> to vector<8x64xf32>
    %100 = math.tanh %98 : vector<8x64xf32>
    %101 = arith.mulf %99, %100 : vector<8x64xf32>
    %cst_13 = arith.constant dense<0.000000e+00> : vector<8x256xf32>
    %102 = tpu.matmul %101, %1, %cst_13 {dimension_numbers = #tpu.dot_dimension_numbers<[1], [0], [0], [1], [0, 0, 1, 1], [], []>} : vector<8x64xf32>, vector<64x256xf32>, vector<8x256xf32> -> vector<8x256xf32>
    %103 = vector.extract_strided_slice %19 {offsets = [0, 3, 0], sizes = [8, 1, 256], strides = [1, 1, 1]} : vector<8x8x256xf32> to vector<8x1x256xf32>
    %104 = vector.shape_cast %103 : vector<8x1x256xf32> to vector<8x256xf32>
    %105 = arith.addf %102, %104 : vector<8x256xf32>
    %106 = vector.extract_strided_slice %105 {offsets = [0, 0], sizes = [8, 192], strides = [1, 1]} : vector<8x256xf32> to vector<8x192xf32>
    %107 = arith.negf %106 : vector<8x192xf32>
    %108 = math.exp %107 : vector<8x192xf32>
    %cst_14 = arith.constant 1.000000e+00 : f32
    %109 = vector.broadcast %cst_14 : f32 to vector<8x192xf32>
    %110 = arith.addf %109, %108 : vector<8x192xf32>
    %111 = arith.divf %109, %110 : vector<8x192xf32>
    %112 = vector.extract_strided_slice %105 {offsets = [0, 192], sizes = [8, 64], strides = [1, 1]} : vector<8x256xf32> to vector<8x64xf32>
    %113 = math.tanh %112 : vector<8x64xf32>
    %114 = vector.extract_strided_slice %111 {offsets = [0, 64], sizes = [8, 64], strides = [1, 1]} : vector<8x192xf32> to vector<8x64xf32>
    %115 = arith.mulf %114, %98 : vector<8x64xf32>
    %116 = vector.extract_strided_slice %111 {offsets = [0, 0], sizes = [8, 64], strides = [1, 1]} : vector<8x192xf32> to vector<8x64xf32>
    %117 = arith.mulf %116, %113 : vector<8x64xf32>
    %118 = arith.addf %115, %117 : vector<8x64xf32>
    %119 = vector.extract_strided_slice %111 {offsets = [0, 128], sizes = [8, 64], strides = [1, 1]} : vector<8x192xf32> to vector<8x64xf32>
    %120 = math.tanh %118 : vector<8x64xf32>
    %121 = arith.mulf %119, %120 : vector<8x64xf32>
    %cst_15 = arith.constant dense<0.000000e+00> : vector<8x256xf32>
    %122 = tpu.matmul %121, %1, %cst_15 {dimension_numbers = #tpu.dot_dimension_numbers<[1], [0], [0], [1], [0, 0, 1, 1], [], []>} : vector<8x64xf32>, vector<64x256xf32>, vector<8x256xf32> -> vector<8x256xf32>
    %123 = vector.extract_strided_slice %19 {offsets = [0, 4, 0], sizes = [8, 1, 256], strides = [1, 1, 1]} : vector<8x8x256xf32> to vector<8x1x256xf32>
    %124 = vector.shape_cast %123 : vector<8x1x256xf32> to vector<8x256xf32>
    %125 = arith.addf %122, %124 : vector<8x256xf32>
    %126 = vector.extract_strided_slice %125 {offsets = [0, 0], sizes = [8, 192], strides = [1, 1]} : vector<8x256xf32> to vector<8x192xf32>
    %127 = arith.negf %126 : vector<8x192xf32>
    %128 = math.exp %127 : vector<8x192xf32>
    %cst_16 = arith.constant 1.000000e+00 : f32
    %129 = vector.broadcast %cst_16 : f32 to vector<8x192xf32>
    %130 = arith.addf %129, %128 : vector<8x192xf32>
    %131 = arith.divf %129, %130 : vector<8x192xf32>
    %132 = vector.extract_strided_slice %125 {offsets = [0, 192], sizes = [8, 64], strides = [1, 1]} : vector<8x256xf32> to vector<8x64xf32>
    %133 = math.tanh %132 : vector<8x64xf32>
    %134 = vector.extract_strided_slice %131 {offsets = [0, 64], sizes = [8, 64], strides = [1, 1]} : vector<8x192xf32> to vector<8x64xf32>
    %135 = arith.mulf %134, %118 : vector<8x64xf32>
    %136 = vector.extract_strided_slice %131 {offsets = [0, 0], sizes = [8, 64], strides = [1, 1]} : vector<8x192xf32> to vector<8x64xf32>
    %137 = arith.mulf %136, %133 : vector<8x64xf32>
    %138 = arith.addf %135, %137 : vector<8x64xf32>
    %139 = vector.extract_strided_slice %131 {offsets = [0, 128], sizes = [8, 64], strides = [1, 1]} : vector<8x192xf32> to vector<8x64xf32>
    %140 = math.tanh %138 : vector<8x64xf32>
    %141 = arith.mulf %139, %140 : vector<8x64xf32>
    %cst_17 = arith.constant dense<0.000000e+00> : vector<8x256xf32>
    %142 = tpu.matmul %141, %1, %cst_17 {dimension_numbers = #tpu.dot_dimension_numbers<[1], [0], [0], [1], [0, 0, 1, 1], [], []>} : vector<8x64xf32>, vector<64x256xf32>, vector<8x256xf32> -> vector<8x256xf32>
    %143 = vector.extract_strided_slice %19 {offsets = [0, 5, 0], sizes = [8, 1, 256], strides = [1, 1, 1]} : vector<8x8x256xf32> to vector<8x1x256xf32>
    %144 = vector.shape_cast %143 : vector<8x1x256xf32> to vector<8x256xf32>
    %145 = arith.addf %142, %144 : vector<8x256xf32>
    %146 = vector.extract_strided_slice %145 {offsets = [0, 0], sizes = [8, 192], strides = [1, 1]} : vector<8x256xf32> to vector<8x192xf32>
    %147 = arith.negf %146 : vector<8x192xf32>
    %148 = math.exp %147 : vector<8x192xf32>
    %cst_18 = arith.constant 1.000000e+00 : f32
    %149 = vector.broadcast %cst_18 : f32 to vector<8x192xf32>
    %150 = arith.addf %149, %148 : vector<8x192xf32>
    %151 = arith.divf %149, %150 : vector<8x192xf32>
    %152 = vector.extract_strided_slice %145 {offsets = [0, 192], sizes = [8, 64], strides = [1, 1]} : vector<8x256xf32> to vector<8x64xf32>
    %153 = math.tanh %152 : vector<8x64xf32>
    %154 = vector.extract_strided_slice %151 {offsets = [0, 64], sizes = [8, 64], strides = [1, 1]} : vector<8x192xf32> to vector<8x64xf32>
    %155 = arith.mulf %154, %138 : vector<8x64xf32>
    %156 = vector.extract_strided_slice %151 {offsets = [0, 0], sizes = [8, 64], strides = [1, 1]} : vector<8x192xf32> to vector<8x64xf32>
    %157 = arith.mulf %156, %153 : vector<8x64xf32>
    %158 = arith.addf %155, %157 : vector<8x64xf32>
    %159 = vector.extract_strided_slice %151 {offsets = [0, 128], sizes = [8, 64], strides = [1, 1]} : vector<8x192xf32> to vector<8x64xf32>
    %160 = math.tanh %158 : vector<8x64xf32>
    %161 = arith.mulf %159, %160 : vector<8x64xf32>
    %cst_19 = arith.constant dense<0.000000e+00> : vector<8x256xf32>
    %162 = tpu.matmul %161, %1, %cst_19 {dimension_numbers = #tpu.dot_dimension_numbers<[1], [0], [0], [1], [0, 0, 1, 1], [], []>} : vector<8x64xf32>, vector<64x256xf32>, vector<8x256xf32> -> vector<8x256xf32>
    %163 = vector.extract_strided_slice %19 {offsets = [0, 6, 0], sizes = [8, 1, 256], strides = [1, 1, 1]} : vector<8x8x256xf32> to vector<8x1x256xf32>
    %164 = vector.shape_cast %163 : vector<8x1x256xf32> to vector<8x256xf32>
    %165 = arith.addf %162, %164 : vector<8x256xf32>
    %166 = vector.extract_strided_slice %165 {offsets = [0, 0], sizes = [8, 192], strides = [1, 1]} : vector<8x256xf32> to vector<8x192xf32>
    %167 = arith.negf %166 : vector<8x192xf32>
    %168 = math.exp %167 : vector<8x192xf32>
    %cst_20 = arith.constant 1.000000e+00 : f32
    %169 = vector.broadcast %cst_20 : f32 to vector<8x192xf32>
    %170 = arith.addf %169, %168 : vector<8x192xf32>
    %171 = arith.divf %169, %170 : vector<8x192xf32>
    %172 = vector.extract_strided_slice %165 {offsets = [0, 192], sizes = [8, 64], strides = [1, 1]} : vector<8x256xf32> to vector<8x64xf32>
    %173 = math.tanh %172 : vector<8x64xf32>
    %174 = vector.extract_strided_slice %171 {offsets = [0, 64], sizes = [8, 64], strides = [1, 1]} : vector<8x192xf32> to vector<8x64xf32>
    %175 = arith.mulf %174, %158 : vector<8x64xf32>
    %176 = vector.extract_strided_slice %171 {offsets = [0, 0], sizes = [8, 64], strides = [1, 1]} : vector<8x192xf32> to vector<8x64xf32>
    %177 = arith.mulf %176, %173 : vector<8x64xf32>
    %178 = arith.addf %175, %177 : vector<8x64xf32>
    %179 = vector.extract_strided_slice %171 {offsets = [0, 128], sizes = [8, 64], strides = [1, 1]} : vector<8x192xf32> to vector<8x64xf32>
    %180 = math.tanh %178 : vector<8x64xf32>
    %181 = arith.mulf %179, %180 : vector<8x64xf32>
    %cst_21 = arith.constant dense<0.000000e+00> : vector<8x256xf32>
    %182 = tpu.matmul %181, %1, %cst_21 {dimension_numbers = #tpu.dot_dimension_numbers<[1], [0], [0], [1], [0, 0, 1, 1], [], []>} : vector<8x64xf32>, vector<64x256xf32>, vector<8x256xf32> -> vector<8x256xf32>
    %183 = vector.extract_strided_slice %19 {offsets = [0, 7, 0], sizes = [8, 1, 256], strides = [1, 1, 1]} : vector<8x8x256xf32> to vector<8x1x256xf32>
    %184 = vector.shape_cast %183 : vector<8x1x256xf32> to vector<8x256xf32>
    %185 = arith.addf %182, %184 : vector<8x256xf32>
    %186 = vector.extract_strided_slice %185 {offsets = [0, 0], sizes = [8, 192], strides = [1, 1]} : vector<8x256xf32> to vector<8x192xf32>
    %187 = arith.negf %186 : vector<8x192xf32>
    %188 = math.exp %187 : vector<8x192xf32>
    %cst_22 = arith.constant 1.000000e+00 : f32
    %189 = vector.broadcast %cst_22 : f32 to vector<8x192xf32>
    %190 = arith.addf %189, %188 : vector<8x192xf32>
    %191 = arith.divf %189, %190 : vector<8x192xf32>
    %192 = vector.extract_strided_slice %185 {offsets = [0, 192], sizes = [8, 64], strides = [1, 1]} : vector<8x256xf32> to vector<8x64xf32>
    %193 = math.tanh %192 : vector<8x64xf32>
    %194 = vector.extract_strided_slice %191 {offsets = [0, 64], sizes = [8, 64], strides = [1, 1]} : vector<8x192xf32> to vector<8x64xf32>
    %195 = arith.mulf %194, %178 : vector<8x64xf32>
    %196 = vector.extract_strided_slice %191 {offsets = [0, 0], sizes = [8, 64], strides = [1, 1]} : vector<8x192xf32> to vector<8x64xf32>
    %197 = arith.mulf %196, %193 : vector<8x64xf32>
    %198 = arith.addf %195, %197 : vector<8x64xf32>
    %199 = vector.extract_strided_slice %191 {offsets = [0, 128], sizes = [8, 64], strides = [1, 1]} : vector<8x192xf32> to vector<8x64xf32>
    %200 = math.tanh %198 : vector<8x64xf32>
    %201 = arith.mulf %199, %200 : vector<8x64xf32>
    %202 = vector.extract_strided_slice %201 {offsets = [0, 32], sizes = [8, 32], strides = [1, 1]} : vector<8x64xf32> to vector<8x32xf32>
    %203 = vector.broadcast %7 : vector<1x32xf32> to vector<8x32xf32>
    %204 = arith.mulf %202, %203 : vector<8x32xf32>
    %cst_23 = arith.constant dense<0.000000e+00> : vector<8xf32>
    %205 = vector.multi_reduction <add>, %204, %cst_23 [1] : vector<8x32xf32> to vector<8xf32>
    %206 = vector.shape_cast %205 : vector<8xf32> to vector<8x1xf32>
    %207 = vector.broadcast %8 : vector<1x1xf32> to vector<8x1xf32>
    %208 = arith.addf %206, %207 : vector<8x1xf32>
    %209 = arith.negf %208 : vector<8x1xf32>
    %210 = math.exp %209 : vector<8x1xf32>
    %cst_24 = arith.constant 1.000000e+00 : f32
    %211 = vector.broadcast %cst_24 : f32 to vector<8x1xf32>
    %212 = arith.addf %211, %210 : vector<8x1xf32>
    %213 = arith.divf %211, %212 : vector<8x1xf32>
    %c0_25 = arith.constant 0 : index
    %c0_26 = arith.constant 0 : index
    %214 = vector.load %arg3[%c0_25, %c0_26] : memref<8x1xf32, #tpu.memory_space<vmem>>, vector<8x1xf32>
    tpu.vector_store %arg3[%c0_25, %c0_26], %213 {strides = array<i32>} : memref<8x1xf32, #tpu.memory_space<vmem>>, vector<8x1xf32>,
    return
  }
}

</mosaic_0001>

<bundles_post_ra>
// kernel: tpu_custom_call.1
= control target key start
LH: loop header
LB: loop body
LE: loop exit
PB: predicated region body
PF: predicated region fallthrough
CT: control target
= control target key end

     0   :  { %8 = vsyncpa [#allocation3], 0  ;;  %s2179_s0 = inlined_call_operand.hbm [shape: f32[8,8], index: 0, kind: input, shape index: {}]   ;;  %s2180_s1 = inlined_call_operand.hbm [shape: f32[64,256], index: 1, kind: input, shape index: {}]   ;;  %s2181_s2 = inlined_call_operand.hbm [shape: f32[8,256], index: 2, kind: input, shape index: {}]   ;;  %s2182_s3 = inlined_call_operand.vmem [shape: f32[8,1], index: 3, kind: output, shape index: {}]  }
   0x1   :  { %9 = vsyncpa [#allocation5], 0  ;;  %s25_s14 = sshll.u32 %s2180_s1, 4  ;;  %s1566_s15 = smov [#allocation4]   ;;  %s26_s14 = int_to_ptr.hbm [resolvable:$true] %s25_s14 }
   0x2   :  { %s27_s16 = sshll.u32 %s1566_s15, 4  ;;  %s15_s19 = sshll.u32 %s2179_s0, 4  ;;  %s28_s16 = int_to_ptr.vmem [resolvable:$true] %s27_s16  ;;  %s16_s19 = int_to_ptr.hbm [resolvable:$true] %s15_s19 }
   0x3   :  { %s1567_s20 = smov 256   ;;  %s1568_s21 = smov 16  }
   0x4   :  { %33 = dma.hbm_to_vmem [thread:$0]  %s26_s14, 2048, %s28_s16, [#allocation5], %s1567_s20, %s1567_s20, %s1568_s21  }
   0x5   :  { %s1569_s22 = smov [#allocation2]   ;;  %s39_s26 = sshll.u32 %s2181_s2, 4  ;;  %s40_s26 = int_to_ptr.hbm [resolvable:$true] %s39_s26 }
   0x6   :  { %s17_s23 = sshll.u32 %s1569_s22, 4  ;;  %s1570_s1 = smov [#allocation6]   ;;  %s18_s23 = int_to_ptr.vmem [resolvable:$true] %s17_s23 }
   0x7   :  { %20 = dma.hbm_to_vmem [thread:$0]  %s16_s19, 128, %s18_s23, [#allocation3]  }
   0x8   :  { %s41_s27 = sshll.u32 %s1570_s1, 4  ;;  %s42_s27 = int_to_ptr.vmem [resolvable:$true] %s41_s27 }
   0x9   :  { %44 = dma.hbm_to_vmem [thread:$0]  %s40_s26, 256, %s42_s27, [#allocation5]  }
   0xa   :  { %1562 = dma.done.wait [#allocation3], 128  }
   0xb   :  { %1563 = vsyncadd [#allocation3], 4294967168 }
   0xc   :  { %1564 = dma.done.wait [#allocation5], 2304  }
   0xd   :  { %1565 = vsyncadd [#allocation5], 4294964992  ;;  %v1571_v0 = vmov 0   ;;  %v57_v1 = vld [vmem:[#allocation2] sm:$0xff]  ;;  %s1572_s0 = smov 127   ;;  %v83_v2 = vlaneseq  ;;  %v1605_v4 = vld [vmem:[#allocation6] sm:$0xff] }
   0xe   :  { %1366 = vset.pattern.permute.xlu0 %v1571_v0  ;;  %77 = vrot.lane.b32.xlu2 %v57_v1, %s1572_s0  ;;  %v178_v5 = vperm.slane %v1605_v4, 2  ;;  %v180_v6 = vperm.slane %v1605_v4, 3  ;;  %vm80_vm0 = vcmask 56320   ;;  %s1573_s2 = smov 32   ;;  %vm217_vm5 = vcmask 261120   ;;  %s1574_s28 = smov 64  }
   0xf   :  { %175 = vperm.xlu0 %1366, %v57_v1   ;;  %v84_v3 = vshrl.u32 %v83_v2, 7  ;;  %v1618_v33 = vld [vmem:[#allocation4 + $0x70] sm:$0xff]  ;;  %v1620_v34 = vld [vmem:[#allocation4 + $0x78] sm:$0xff]  ;;  %v1622_v35 = vld [vmem:[#allocation4 + $0x60] sm:$0xff]  ;;  %vm273_vm6 = vcmask 523264   ;;  %vm237_vm7 = vcmask 1041409  }
  0x10   :  { %285 = vmatpush.msra.mxu0 %v1618_v33  ;;  %305 = vmatpush.msra.mxu1 %v1620_v34  ;;  %v1626_v36 = vld [vmem:[#allocation4 + $0x68] sm:$0xff]  ;;  %v1628_v37 = vld [vmem:[#allocation4 + $0x50] sm:$0xff]  ;;  %v1630_v38 = vld [vmem:[#allocation4 + $0x58] sm:$0xff]  ;;  %vm240_vm8 = vcmask 1042434   ;;  %vm243_vm9 = vcmask 1043459   ;;  %vm246_vm10 = vcmask 1044484  }
  0x11   :  { %1369 = vset.pattern.permute.xlu1 %v84_v3  ;;  %1367 = vset.pattern.permute.xlu2 %v84_v3  ;;  %v1635_v39 = vld [vmem:[#allocation4 + $0x40] sm:$0xff]  ;;  %v1637_v40 = vld [vmem:[#allocation4 + $0x48] sm:$0xff]  ;;  %v1644_v44 = vld [vmem:[#allocation4 + $0x30] sm:$0xff]  ;;  %vm249_vm11 = vcmask 1045509   ;;  %vm252_vm12 = vcmask 1046534   ;;  %vm255_vm13 = vcmask 1047559  }
  0x12   :  { %418 = vmatpush.msra.mxu2 %v1618_v33  ;;  %286 = vmatpush.msra.mxu0 %v1622_v35  ;;  %v1646_v45 = vld [vmem:[#allocation4 + $0x38] sm:$0xff]  ;;  %v1653_v46 = vld [vmem:[#allocation4 + $0x20] sm:$0xff]  ;;  %v1655_v47 = vld [vmem:[#allocation4 + $0x28] sm:$0xff]  ;;  %s1575_s29 = smov 96  }
  0x13   :  { %306 = vmatpush.msra.mxu1 %v1626_v36  ;;  %438 = vmatpush.msra.mxu3 %v1620_v34  ;;  %v1660_v48 = vld [vmem:[#allocation4 + $0x10] sm:$0xff]  ;;  %v1662_v49 = vld [vmem:[#allocation4 + $0x18] sm:$0xff]  ;;  %v1680_v54 = vld [vmem:[#allocation4] sm:$0xff] }
  0x14   :  { %419 = vmatpush.msra.mxu2 %v1622_v35  ;;  %287 = vmatpush.msra.mxu0 %v1628_v37  ;;  %v1682_v55 = vld [vmem:[#allocation4 + $0x8] sm:$0xff] }
  0x15   :  { %307 = vmatpush.msra.mxu1 %v1630_v38  ;;  %439 = vmatpush.msra.mxu3 %v1626_v36  ;;  %v75_v61 = vld [vmem:[#allocation6 + $0x8] sm:$0xff] }
  0x16   :  { %420 = vmatpush.msra.mxu2 %v1628_v37  ;;  %288 = vmatpush.msra.mxu0 %v1635_v39  ;;  %v157_v1 = vperm.slane %v75_v61, 1 }
  0x17   :  { %1368 = vset.pattern.permute.xlu0 %v84_v3  ;;  %308 = vmatpush.msra.mxu1 %v1637_v40 }
  0x18   :  { %440 = vmatpush.msra.mxu3 %v1630_v38  ;;  %289 = vmatpush.msra.mxu0 %v1644_v44 }
  0x19   :  { %309 = vmatpush.msra.mxu1 %v1646_v45  ;;  %421 = vmatpush.msra.mxu2 %v1635_v39 }
  0x1a   :  { %290 = vmatpush.msra.mxu0 %v1653_v46  ;;  %441 = vmatpush.msra.mxu3 %v1637_v40 }
  0x1b   :  { %310 = vmatpush.msra.mxu1 %v1655_v47  ;;  %422 = vmatpush.msra.mxu2 %v1644_v44 }
  0x1c   :  { %291 = vmatpush.msra.mxu0 %v1660_v48  ;;  %442 = vmatpush.msra.mxu3 %v1646_v45 }
  0x1d   :  { %311 = vmatpush.msra.mxu1 %v1662_v49  ;;  %423 = vmatpush.msra.mxu2 %v1653_v46 }
  0x1e   :  { %443 = vmatpush.msra.mxu3 %v1655_v47  ;;  %292 = vmatpush.msra.mxu0 %v1680_v54 }
  0x1f   :  { %424 = vmatpush.msra.mxu2 %v1660_v48  ;;  %312 = vmatpush.msra.mxu1 %v1682_v55 }
  0x20   :  { %444 = vmatpush.msra.mxu3 %v1662_v49  ;;  %547 = vmatpush.msrb.mxu0 %v1618_v33 }
  0x21   :  { %425 = vmatpush.msra.mxu2 %v1680_v54  ;;  %567 = vmatpush.msrb.mxu1 %v1620_v34 }
  0x22   :  { %445 = vmatpush.msra.mxu3 %v1682_v55  ;;  %548 = vmatpush.msrb.mxu0 %v1622_v35 }
  0x23   :  { %676 = vmatpush.msrb.mxu2 %v1618_v33  ;;  %568 = vmatpush.msrb.mxu1 %v1626_v36 }
  0x24   :  { %696 = vmatpush.msrb.mxu3 %v1620_v34  ;;  %549 = vmatpush.msrb.mxu0 %v1628_v37 }
  0x25   :  { %677 = vmatpush.msrb.mxu2 %v1622_v35  ;;  %569 = vmatpush.msrb.mxu1 %v1630_v38 }
  0x26   :  { %697 = vmatpush.msrb.mxu3 %v1626_v36  ;;  %550 = vmatpush.msrb.mxu0 %v1635_v39 }
  0x27   :  { %678 = vmatpush.msrb.mxu2 %v1628_v37  ;;  %570 = vmatpush.msrb.mxu1 %v1637_v40 }
  0x28   :  { %698 = vmatpush.msrb.mxu3 %v1630_v38  ;;  %551 = vmatpush.msrb.mxu0 %v1644_v44 }
  0x29   :  { %679 = vmatpush.msrb.mxu2 %v1635_v39  ;;  %571 = vmatpush.msrb.mxu1 %v1646_v45 }
  0x2a   :  { %699 = vmatpush.msrb.mxu3 %v1637_v40  ;;  %552 = vmatpush.msrb.mxu0 %v1653_v46 }
  0x2b   :  { %680 = vmatpush.msrb.mxu2 %v1644_v44  ;;  %572 = vmatpush.msrb.mxu1 %v1655_v47 }
  0x2c   :  { %700 = vmatpush.msrb.mxu3 %v1646_v45  ;;  %553 = vmatpush.msrb.mxu0 %v1660_v48 }
  0x2d   :  { %681 = vmatpush.msrb.mxu2 %v1653_v46  ;;  %573 = vmatpush.msrb.mxu1 %v1662_v49 }
  0x2e   :  { %701 = vmatpush.msrb.mxu3 %v1655_v47  ;;  %554 = vmatpush.msrb.mxu0 %v1680_v54 }
  0x2f   :  { %682 = vmatpush.msrb.mxu2 %v1660_v48  ;;  %574 = vmatpush.msrb.mxu1 %v1682_v55 }
  0x30   :  { %702 = vmatpush.msrb.mxu3 %v1662_v49 }
  0x31   :  { %683 = vmatpush.msrb.mxu2 %v1680_v54 }
  0x32   :  { %703 = vmatpush.msrb.mxu3 %v1682_v55 }
  0x68   :  { %v78_v10 = vpop.permute.xlu2 %77 }
  0x69   :  { %v1610_v12 = vsel %vm80_vm0, %v78_v10, 0.0 }
  0x6a   :  { %v96_v13 = vperm.slane %v1610_v12, 2  ;;  %v124_v14 = vperm.slane %v1610_v12, 6  ;;  %v89_v32 = vperm.slane %v1610_v12, 1  ;;  %v103_v43 = vperm.slane %v1610_v12, 3 }
  0x6b   :  { %v82_v50 = vperm.slane %v1610_v12, 0  ;;  %v117_v51 = vperm.slane %v1610_v12, 5  ;;  %v110_v52 = vperm.slane %v1610_v12, 4  ;;  %v131_v53 = vperm.slane %v1610_v12, 7 }
  0x6c   :  { %94 = vperm.xlu2 %1367, %v89_v32  }
  0x74   :  { %108 = vperm.xlu2 %1367, %v103_v43  }
  0x7c   :  { %122 = vperm.xlu2 %1367, %v117_v51  }
  0x81   :  { %v176_v7 = vpop.permute.xlu0 %175 }
  0x82   :  { %v179_v8 = vmul.f32 %v178_v5, %v176_v7 }
  0x84   :  { %v181_v9 = vadd.f32 %v180_v6, %v179_v8 }
  0x86   :  { %1371 = vtanh.f32 %v181_v9  ;;  %v1322_v15 = vmul.f32 -1.442695, %v181_v9 }
  0x88   :  { %1373 = vpow2.f32 %v1322_v15 }
  0x8c   :  { %v1372_v11 = vpop.eup %1371 }
  0x8d   :  { %203 = vrot.lane.b32.xlu0 %v1372_v11, %s1573_s2 }
  0x8e   :  { %v1374_v16 = vpop.eup %1373 }
  0x8f   :  { %v185_v17 = vadd.f32 1.0, %v1374_v16 }
  0x91   :  { %1375 = vrcp.f32 %v185_v17  ;;  %v197_v23 = vand.u32 2147483648, %v185_v17  ;;  %vm191_vm2 = vweird.f32 %v185_v17  ;;  %v195_v24 = vand.u32 2147483647, %v185_v17 }
  0x93   :  { %v198_v26 = vor.u32 1.1754944e-38, %v197_v23  ;;  %vm196_vm4 = vcmp.eq.f32.partialorder %v195_v24, 8.507059e+37 }
  0x95   :  { %101 = vperm.xlu0 %1368, %v96_v13  }
  0x97   :  { %v1376_v18 = vpop.eup %1375 }
  0x98   :  { %v187_v19 = vmul.f32 %v1376_v18, %v185_v17  ;;  %vm192_vm1 = vweird.f32 %v1376_v18 }
  0x99   :  { %vm193_vm3 = vmor %vm191_vm2, %vm192_vm1 }
  0x9a   :  { %v188_v20 = vsub.f32 1.0, %v187_v19 }
  0x9c   :  { %v189_v21 = vmul.f32 %v1376_v18, %v188_v20 }
  0x9d   :  { %129 = vperm.xlu0 %1368, %v124_v14  }
  0x9e   :  { %v190_v22 = vadd.f32 %v1376_v18, %v189_v21 }
  0xa0   :  { %v194_v25 = vsel %vm193_vm3, %v1376_v18, %v190_v22 }
  0xa1   :  { %v199_v28 = vsel %vm196_vm4, %v198_v26, %v194_v25 }
  0xa5   :  { %1370 = vset.pattern.permute.xlu0 %v1571_v0  ;;  %v139_v0 = vperm.slane %v75_v61, 0 }
  0xc6   :  { %v1739_v58 = vpop.permute.xlu2 %94 }
  0xc7   :  { %v143_v6 = vmul.f32 %v139_v0, %v1739_v58 }
  0xc9   :  { %v1769_v18 = vadd.f32 %v157_v1, %v143_v6 }
  0xce   :  { %v1743_v60 = vpop.permute.xlu2 %108 }
  0xcf   :  { %v147_v12 = vmul.f32 %v139_v0, %v1743_v60 }
  0xd1   :  { %v1773_v20 = vadd.f32 %v157_v1, %v147_v12 }
  0xd3   :  { %v395_v26 = vrot.slane %v1773_v20, 6  ;;  %v524_v51 = vrot.slane %v1773_v20, 7 }
  0xd6   :  { %v1751_v5 = vpop.permute.xlu2 %122 }
  0xd7   :  { %v151_v8 = vmul.f32 %v139_v0, %v1751_v5 }
  0xd9   :  { %v1771_v19 = vadd.f32 %v157_v1, %v151_v8 }
  0xff   :  { %v204_v27 = vpop.permute.xlu0 %203 }
 0x100   :  { %v206_v29 = vmul.f32 %v204_v27, %v199_v28 }
 0x102   :  { %1377 = vtanh.f32 %v206_v29  ;;  %v219_v30 = vsel %vm217_vm5, %v206_v29, 0.0 }
 0x103   :  { %357 = vrot.lane.b32.xlu0 %v219_v30, %s1574_s28 }
 0x107   :  { %v1747_v63 = vpop.permute.xlu0 %101 }
 0x108   :  { %v1378_v31 = vpop.eup %1377  ;;  %v145_v3 = vmul.f32 %v139_v0, %v1747_v63 }
 0x109   :  { %209 = vrot.lane.b32.xlu1 %v1378_v31, %s1574_s28 }
 0x10a   :  { %v1759_v10 = vadd.f32 %v157_v1, %v145_v3 }
 0x10c   :  { %v393_v17 = vrot.slane %v1759_v10, 7 }
 0x10f   :  { %v1761_v11 = vpop.permute.xlu0 %129 }
 0x110   :  { %v153_v13 = vmul.f32 %v139_v0, %v1761_v11 }
 0x112   :  { %v1775_v21 = vadd.f32 %v157_v1, %v153_v13  ;;  %v650_v13 = vrot.slane %v1769_v18, 2 }
 0x114   :  { %v401_v29 = vrot.slane %v1775_v21, 3 }
 0x17b   :  { %v210_v41 = vpop.permute.xlu1 %209 }
 0x17c   :  { %v212_v42 = vmul.f32 %v210_v41, %v199_v28  ;;  %v399_v28 = vrot.slane %v1771_v19, 4 }
 0x17e   :  { %214 = vrot.lane.b32.xlu1 %v212_v42, %s1574_s28 }
 0x186   :  { %87 = vperm.xlu1 %1369, %v82_v50   ;;  %v521_v50 = vrot.slane %v1769_v18, 1 }
 0x18e   :  { %115 = vperm.xlu1 %1369, %v110_v52  }
 0x196   :  { %136 = vperm.xlu1 %1369, %v131_v53  }
 0x1f0   :  { %v215_v56 = vpop.permute.xlu1 %214 }
 0x1f1   :  { %v218_v57 = vsel %vm217_vm5, %v215_v56, 0.0 }
 0x1f2   :  { %1323 = vmatmul.msk.f32.vlgmr.msra.gmra.mxu0 %vm273_vm6, %v218_v57  ;;  %1324 = vmatmul.msk.f32.vlgmr.msra.gmra.mxu1 %vm273_vm6, %v218_v57  ;;  %v528_v57 = vrot.slane %v1771_v19, 5 }
 0x1f3   :  { %805 = vmatpush.msra.mxu0 %v1618_v33  ;;  %825 = vmatpush.msra.mxu1 %v1620_v34 }
 0x1f5   :  { %806 = vmatpush.msra.mxu0 %v1622_v35  ;;  %826 = vmatpush.msra.mxu1 %v1626_v36 }
 0x1f7   :  { %807 = vmatpush.msra.mxu0 %v1628_v37  ;;  %827 = vmatpush.msra.mxu1 %v1630_v38 }
 0x1f8   :  { %v1741_v59 = vpop.permute.xlu1 %87 }
 0x1f9   :  { %808 = vmatpush.msra.mxu0 %v1635_v39  ;;  %828 = vmatpush.msra.mxu1 %v1637_v40  ;;  %v141_v2 = vmul.f32 %v139_v0, %v1741_v59 }
 0x1fb   :  { %809 = vmatpush.msra.mxu0 %v1644_v44  ;;  %829 = vmatpush.msra.mxu1 %v1646_v45  ;;  %v1754_v7 = vadd.f32 %v157_v1, %v141_v2 }
 0x1fd   :  { %810 = vmatpush.msra.mxu0 %v1653_v46  ;;  %830 = vmatpush.msra.mxu1 %v1655_v47  ;;  %v391_v15 = vrot.slane %v1754_v7, 1  ;;  %v520_v42 = vrot.slane %v1754_v7, 2  ;;  %v649_v12 = vrot.slane %v1754_v7, 3 }
 0x1ff   :  { %811 = vmatpush.msra.mxu0 %v1660_v48  ;;  %831 = vmatpush.msra.mxu1 %v1662_v49  ;;  %v392_v23 = vsel %vm237_vm7, %v1769_v18, %v391_v15  ;;  %v522_v56 = vsel %vm237_vm7, %v521_v50, %v520_v42  ;;  %v652_v15 = vrot.slane %v1759_v10, 1  ;;  %v781_v42 = vrot.slane %v1759_v10, 2 }
 0x200   :  { %v1745_v62 = vpop.permute.xlu1 %115  ;;  %v394_v25 = vsel %vm240_vm8, %v393_v17, %v392_v23  ;;  %v523_v61 = vsel %vm240_vm8, %v1759_v10, %v522_v56  ;;  %v651_v17 = vsel %vm237_vm7, %v650_v13, %v649_v12  ;;  %v657_v23 = vrot.slane %v1771_v19, 6 }
 0x201   :  { %812 = vmatpush.msra.mxu0 %v1680_v54  ;;  %832 = vmatpush.msra.mxu1 %v1682_v55  ;;  %v149_v14 = vmul.f32 %v139_v0, %v1745_v62  ;;  %v396_v30 = vsel %vm243_vm9, %v395_v26, %v394_v25  ;;  %v653_v25 = vsel %vm240_vm8, %v652_v15, %v651_v17  ;;  %v659_v26 = vrot.slane %v1775_v21, 5 }
 0x202   :  { %v783_v50 = vrot.slane %v1773_v20, 1  ;;  %v907_v56 = vrot.slane %v1754_v7, 5 }
 0x203   :  { %v1777_v22 = vadd.f32 %v157_v1, %v149_v14 }
 0x205   :  { %v397_v27 = vrot.slane %v1777_v22, 5  ;;  %v526_v53 = vrot.slane %v1777_v22, 6 }
 0x207   :  { %v398_v32 = vsel %vm246_vm10, %v397_v27, %v396_v30  ;;  %v654_v27 = vsel %vm243_vm9, %v1773_v20, %v653_v25  ;;  %v917_v25 = vrot.slane %v1775_v21, 7 }
 0x208   :  { %v1757_v9 = vpop.permute.xlu1 %136  ;;  %v400_v41 = vsel %vm249_vm11, %v399_v28, %v398_v32 }
 0x209   :  { %v155_v16 = vmul.f32 %v139_v0, %v1757_v9  ;;  %v402_v43 = vsel %vm252_vm12, %v401_v29, %v400_v41  ;;  %v530_v0 = vrot.slane %v1775_v21, 4  ;;  %v779_v41 = vrot.slane %v1769_v18, 3 }
 0x20b   :  { %v1781_v24 = vadd.f32 %v157_v1, %v155_v16  ;;  %v525_v1 = vsel %vm243_vm9, %v524_v51, %v523_v61  ;;  %v655_v16 = vrot.slane %v1777_v22, 7 }
 0x20c   :  { %v527_v3 = vsel %vm246_vm10, %v526_v53, %v525_v1  ;;  %v786_v53 = vrot.slane %v1771_v19, 7  ;;  %v910_v1 = vrot.slane %v1759_v10, 3 }
 0x20d   :  { %v403_v31 = vrot.slane %v1781_v24, 2  ;;  %v532_v2 = vrot.slane %v1781_v24, 3  ;;  %v529_v6 = vsel %vm249_vm11, %v528_v57, %v527_v3  ;;  %v661_v28 = vrot.slane %v1781_v24, 4 }
 0x20e   :  { %v531_v8 = vsel %vm252_vm12, %v530_v0, %v529_v6  ;;  %v656_v29 = vsel %vm246_vm10, %v655_v16, %v654_v27  ;;  %v908_v57 = vrot.slane %v1769_v18, 4  ;;  %v788_v0 = vrot.slane %v1775_v21, 6 }
 0x20f   :  { %v1797_v52 = vsel %vm255_vm13, %v403_v31, %v402_v43  ;;  %v1813_v14 = vsel %vm255_vm13, %v532_v2, %v531_v8  ;;  %v658_v30 = vsel %vm249_vm11, %v657_v23, %v656_v29  ;;  %v778_v31 = vrot.slane %v1754_v7, 4 }
 0x210   :  { %v660_v32 = vsel %vm252_vm12, %v659_v26, %v658_v30  ;;  %v790_v3 = vrot.slane %v1781_v24, 5  ;;  %v909_v12 = vsel %vm237_vm7, %v908_v57, %v907_v56  ;;  %v912_v16 = vrot.slane %v1773_v20, 2 }
 0x211   :  { %v1831_v43 = vsel %vm255_vm13, %v661_v28, %v660_v32  ;;  %v780_v51 = vsel %vm237_vm7, %v779_v41, %v778_v31  ;;  %v911_v15 = vsel %vm240_vm8, %v910_v1, %v909_v12  ;;  %v914_v23 = vrot.slane %v1777_v22, 1 }
 0x212   :  { %v782_v61 = vsel %vm240_vm8, %v781_v42, %v780_v51  ;;  %v913_v26 = vsel %vm243_vm9, %v912_v16, %v911_v15  ;;  %v919_v27 = vrot.slane %v1781_v24, 6  ;;  %v1036_v31 = vrot.slane %v1754_v7, 6 }
 0x213   :  { %v784_v2 = vsel %vm243_vm9, %v783_v50, %v782_v61  ;;  %v915_v28 = vsel %vm246_vm10, %v914_v23, %v913_v26  ;;  %v1037_v32 = vrot.slane %v1769_v18, 5  ;;  %v1039_v42 = vrot.slane %v1759_v10, 4 }
 0x214   :  { %v785_v6 = vsel %vm246_vm10, %v1777_v22, %v784_v2  ;;  %v916_v29 = vsel %vm249_vm11, %v1771_v19, %v915_v28  ;;  %v1041_v50 = vrot.slane %v1773_v20, 3  ;;  %v1045_v56 = vrot.slane %v1771_v19, 1 }
 0x215   :  { %v787_v8 = vsel %vm249_vm11, %v786_v53, %v785_v6  ;;  %v918_v30 = vsel %vm252_vm12, %v917_v25, %v916_v29  ;;  %v1038_v51 = vsel %vm237_vm7, %v1037_v32, %v1036_v31  ;;  %v1043_v53 = vrot.slane %v1777_v22, 2 }
 0x216   :  { %v789_v13 = vsel %vm252_vm12, %v788_v0, %v787_v8  ;;  %v1864_v41 = vsel %vm255_vm13, %v919_v27, %v918_v30  ;;  %v1040_v57 = vsel %vm240_vm8, %v1039_v42, %v1038_v51  ;;  %v1048_v0 = vrot.slane %v1781_v24, 7 }
 0x217   :  { %v1851_v17 = vsel %vm255_vm13, %v790_v3, %v789_v13  ;;  %v1042_v61 = vsel %vm243_vm9, %v1041_v50, %v1040_v57  ;;  %v1165_v6 = vrot.slane %v1754_v7, 7  ;;  %v1166_v12 = vrot.slane %v1769_v18, 6 }
 0x218   :  { %v1044_v1 = vsel %vm246_vm10, %v1043_v53, %v1042_v61  ;;  %v1168_v13 = vrot.slane %v1759_v10, 5  ;;  %v1170_v15 = vrot.slane %v1773_v20, 4  ;;  %v1172_v16 = vrot.slane %v1777_v22, 3 }
 0x219   :  { %v1046_v2 = vsel %vm249_vm11, %v1045_v56, %v1044_v1  ;;  %v1167_v23 = vsel %vm237_vm7, %v1166_v12, %v1165_v6  ;;  %v1174_v25 = vrot.slane %v1771_v19, 2  ;;  %v1176_v27 = vrot.slane %v1775_v21, 1 }
 0x21a   :  { %v1047_v3 = vsel %vm252_vm12, %v1775_v21, %v1046_v2  ;;  %v1169_v26 = vsel %vm240_vm8, %v1168_v13, %v1167_v23  ;;  %v257_v42 = vrot.slane %v1769_v18, 7  ;;  %v259_v50 = vrot.slane %v1759_v10, 6 }
 0x21b   :  { %v1880_v8 = vsel %vm255_vm13, %v1048_v0, %v1047_v3  ;;  %v1171_v28 = vsel %vm243_vm9, %v1170_v15, %v1169_v26  ;;  %v261_v53 = vrot.slane %v1773_v20, 5  ;;  %v263_v57 = vrot.slane %v1777_v22, 4 }
 0x21c   :  { %v1173_v29 = vsel %vm246_vm10, %v1172_v16, %v1171_v28  ;;  %v258_v51 = vsel %vm237_vm7, %v257_v42, %v1754_v7  ;;  %v265_v0 = vrot.slane %v1771_v19, 3  ;;  %v267_v2 = vrot.slane %v1775_v21, 2 }
 0x21d   :  { %v1175_v30 = vsel %vm249_vm11, %v1174_v25, %v1173_v29  ;;  %v260_v56 = vsel %vm240_vm8, %v259_v50, %v258_v51  ;;  %v269_v10 = vrot.slane %v1781_v24, 1  ;;  %v138_v19 = vperm.slane %v1605_v4, 0 }
 0x21e   :  { %v1177_v31 = vsel %vm252_vm12, %v1176_v27, %v1175_v30  ;;  %v262_v61 = vsel %vm243_vm9, %v261_v53, %v260_v56  ;;  %v156_v21 = vperm.slane %v1605_v4, 1 }
 0x21f   :  { %v1896_v32 = vsel %vm255_vm13, %v1781_v24, %v1177_v31  ;;  %v264_v1 = vsel %vm246_vm10, %v263_v57, %v262_v61  ;;  %v142_v12 = vmul.f32 %v138_v19, %v1739_v58  ;;  %v144_v24 = vmul.f32 %v138_v19, %v1747_v63 }
 0x220   :  { %v266_v18 = vsel %vm249_vm11, %v265_v0, %v264_v1  ;;  %v140_v15 = vmul.f32 %v138_v19, %v1741_v59  ;;  %v146_v16 = vmul.f32 %v138_v19, %v1743_v60  ;;  %v148_v27 = vmul.f32 %v138_v19, %v1745_v62 }
 0x221   :  { %v268_v7 = vsel %vm252_vm12, %v267_v2, %v266_v18  ;;  %v1921_v13 = vadd.f32 %v156_v21, %v142_v12  ;;  %v1926_v25 = vadd.f32 %v156_v21, %v144_v24  ;;  %v150_v58 = vmul.f32 %v138_v19, %v1751_v5 }
 0x222   :  { %v270_v20 = vsel %vm255_vm13, %v269_v10, %v268_v7  ;;  %v1928_v26 = vadd.f32 %v156_v21, %v140_v15  ;;  %v1932_v28 = vadd.f32 %v156_v21, %v146_v16  ;;  %v1938_v60 = vadd.f32 %v156_v21, %v148_v27 }
 0x223   :  { %v236_v23 = vrot.slane %v1921_v13, 7  ;;  %v239_v4 = vrot.slane %v1926_v25, 6  ;;  %v1941_v30 = vadd.f32 %v156_v21, %v150_v58  ;;  %v152_v31 = vmul.f32 %v138_v19, %v1761_v11  ;;  %v358_v58 = vpop.permute.xlu0 %357 }
 0x224   :  { %v242_v59 = vrot.slane %v1932_v28, 5  ;;  %v245_v62 = vrot.slane %v1938_v60, 4  ;;  %v154_v50 = vmul.f32 %v138_v19, %v1757_v9 }
 0x225   :  { %v238_v63 = vsel %vm237_vm7, %v236_v23, %v1928_v26  ;;  %v248_v5 = vrot.slane %v1941_v30, 3  ;;  %v1948_v51 = vadd.f32 %v156_v21, %v152_v31 }
 0x226   :  { %v241_v29 = vsel %vm240_vm8, %v239_v4, %v238_v63  ;;  %v1952_v57 = vadd.f32 %v156_v21, %v154_v50 }
 0x227   :  { %v244_v42 = vsel %vm243_vm9, %v242_v59, %v241_v29  ;;  %v251_v56 = vrot.slane %v1948_v51, 2 }
 0x228   :  { %v247_v53 = vsel %vm246_vm10, %v245_v62, %v244_v42  ;;  %v254_v11 = vrot.slane %v1952_v57, 1 }
 0x229   :  { %v250_v61 = vsel %vm249_vm11, %v248_v5, %v247_v53 }
 0x22a   :  { %v253_v0 = vsel %vm252_vm12, %v251_v56, %v250_v61 }
 0x22b   :  { %v256_v2 = vsel %vm255_vm13, %v254_v11, %v253_v0 }
 0x26f   :  { %v314_v3 = vpop.f32.mrf.mxu1  ;;  %v294_v1 = vpop.f32.mrf.mxu0 }
 0x270   :  { %v1913_v6 = vadd.f32 %v314_v3, %v270_v20  ;;  %v295_v9 = vadd.f32 %v294_v1, %v256_v2 }
 0x272   :  { %1379 = vtanh.f32 %v1913_v6  ;;  %v1325_v18 = vmul.f32 -1.442695, %v295_v9  ;;  %v1326_v62 = vmul.f32 -1.442695, %v1913_v6 }
 0x274   :  { %1381 = vpow2.f32 %v1325_v18 }
 0x278   :  { %v1380_v22 = vpop.eup %1379 }
 0x279   :  { %362 = vrot.lane.b32.xlu2 %v1380_v22, %s1574_s28 }
 0x27a   :  { %v1382_v10 = vpop.eup %1381 }
 0x27b   :  { %v323_v7 = vadd.f32 1.0, %v1382_v10 }
 0x27d   :  { %1383 = vrcp.f32 %v323_v7  ;;  %v336_v12 = vand.u32 2147483648, %v323_v7  ;;  %vm330_vm15 = vweird.f32 %v323_v7  ;;  %v334_v24 = vand.u32 2147483647, %v323_v7 }
 0x27f   :  { %v337_v16 = vor.u32 1.1754944e-38, %v336_v12  ;;  %vm335_vm1 = vcmp.eq.f32.partialorder %v334_v24, 8.507059e+37  ;;  %v381_v12 = vrot.slane %v1932_v28, 6 }
 0x283   :  { %v1384_v20 = vpop.eup %1383 }
 0x284   :  { %v326_v3 = vmul.f32 %v1384_v20, %v323_v7  ;;  %vm331_vm14 = vweird.f32 %v1384_v20 }
 0x285   :  { %vm332_vm0 = vmor %vm330_vm15, %vm331_vm14 }
 0x286   :  { %v327_v22 = vsub.f32 1.0, %v326_v3 }
 0x288   :  { %v328_v19 = vmul.f32 %v1384_v20, %v327_v22  ;;  %v377_v22 = vrot.slane %v1928_v26, 1 }
 0x28a   :  { %v329_v21 = vadd.f32 %v1384_v20, %v328_v19  ;;  %v379_v19 = vrot.slane %v1926_v25, 7 }
 0x28c   :  { %v333_v15 = vsel %vm332_vm0, %v1384_v20, %v329_v21  ;;  %v378_v21 = vsel %vm237_vm7, %v1921_v13, %v377_v22 }
 0x28d   :  { %v338_v27 = vsel %vm335_vm1, %v337_v16, %v333_v15  ;;  %v380_v24 = vsel %vm240_vm8, %v379_v19, %v378_v21  ;;  %v383_v15 = vrot.slane %v1938_v60, 5 }
 0x28e   :  { %v360_v63 = vmul.f32 %v358_v58, %v338_v27  ;;  %v382_v16 = vsel %vm243_vm9, %v381_v12, %v380_v24  ;;  %v389_v58 = vrot.slane %v1952_v57, 2 }
 0x2d3   :  { %v363_v23 = vpop.permute.xlu2 %362 }
 0x2d4   :  { %v365_v4 = vmul.f32 %v363_v23, %v338_v27  ;;  %v384_v23 = vsel %vm246_vm10, %v383_v15, %v382_v16  ;;  %v387_v27 = vrot.slane %v1948_v51, 3 }
 0x2d6   :  { %367 = vrot.lane.b32.xlu1 %v365_v4, %s1574_s28 }
 0x348   :  { %v368_v59 = vpop.permute.xlu1 %367 }
 0x349   :  { %v1959_v29 = vadd.f32 %v368_v59, %v360_v63 }
 0x34b   :  { %1385 = vtanh.f32 %v1959_v29 }
 0x34c   :  { %1387 = vpow2.f32 %v1326_v62 }
 0x351   :  { %v1386_v31 = vpop.eup %1385 }
 0x352   :  { %373 = vrot.lane.b32.xlu2 %v1386_v31, %s1574_s28  ;;  %v1388_v42 = vpop.eup %1387 }
 0x353   :  { %v324_v50 = vadd.f32 1.0, %v1388_v42 }
 0x355   :  { %1389 = vrcp.f32 %v324_v50  ;;  %v351_v0 = vand.u32 2147483648, %v324_v50  ;;  %vm345_vm3 = vweird.f32 %v324_v50  ;;  %v349_v1 = vand.u32 2147483647, %v324_v50 }
 0x357   :  { %v352_v9 = vor.u32 1.1754944e-38, %v351_v0  ;;  %vm350_vm14 = vcmp.eq.f32.partialorder %v349_v1, 8.507059e+37 }
 0x35b   :  { %v1390_v5 = vpop.eup %1389 }
 0x35c   :  { %v341_v53 = vmul.f32 %v1390_v5, %v324_v50  ;;  %vm346_vm2 = vweird.f32 %v1390_v5 }
 0x35d   :  { %vm347_vm4 = vmor %vm345_vm3, %vm346_vm2 }
 0x35e   :  { %v342_v56 = vsub.f32 1.0, %v341_v53 }
 0x360   :  { %v343_v61 = vmul.f32 %v1390_v5, %v342_v56 }
 0x362   :  { %v344_v11 = vadd.f32 %v1390_v5, %v343_v61 }
 0x364   :  { %v348_v2 = vsel %vm347_vm4, %v1390_v5, %v344_v11 }
 0x365   :  { %v353_v18 = vsel %vm350_vm14, %v352_v9, %v348_v2 }
 0x3ac   :  { %v374_v10 = vpop.permute.xlu2 %373 }
 0x3ad   :  { %v376_v6 = vmul.f32 %v374_v10, %v353_v18 }
 0x3af   :  { %1327 = vmatmul.msk.f32.vlgmr.msra.gmra.mxu2 %vm273_vm6, %v376_v6  ;;  %1328 = vmatmul.msk.f32.vlgmr.msra.gmra.mxu3 %vm273_vm6, %v376_v6 }
 0x3b0   :  { %934 = vmatpush.msra.mxu2 %v1618_v33  ;;  %954 = vmatpush.msra.mxu3 %v1620_v34 }
 0x3b2   :  { %935 = vmatpush.msra.mxu2 %v1622_v35  ;;  %955 = vmatpush.msra.mxu3 %v1626_v36 }
 0x3b4   :  { %936 = vmatpush.msra.mxu2 %v1628_v37  ;;  %956 = vmatpush.msra.mxu3 %v1630_v38 }
 0x3b6   :  { %937 = vmatpush.msra.mxu2 %v1635_v39  ;;  %957 = vmatpush.msra.mxu3 %v1637_v40 }
 0x3b8   :  { %938 = vmatpush.msra.mxu2 %v1644_v44  ;;  %958 = vmatpush.msra.mxu3 %v1646_v45 }
 0x3ba   :  { %939 = vmatpush.msra.mxu2 %v1653_v46  ;;  %959 = vmatpush.msra.mxu3 %v1655_v47 }
 0x3bc   :  { %940 = vmatpush.msra.mxu2 %v1660_v48  ;;  %960 = vmatpush.msra.mxu3 %v1662_v49 }
 0x3be   :  { %941 = vmatpush.msra.mxu2 %v1680_v54  ;;  %961 = vmatpush.msra.mxu3 %v1682_v55 }
 0x432   :  { %v447_v7 = vpop.f32.mrf.mxu3  ;;  %v427_v59 = vpop.f32.mrf.mxu2 }
 0x433   :  { %v448_v20 = vadd.f32 %v447_v7, %v1797_v52  ;;  %v385_v52 = vrot.slane %v1941_v30, 4 }
 0x435   :  { %1391 = vtanh.f32 %v448_v20  ;;  %v386_v4 = vsel %vm249_vm11, %v385_v52, %v384_v23  ;;  %v1330_v12 = vmul.f32 -1.442695, %v448_v20 }
 0x436   :  { %v388_v63 = vsel %vm252_vm12, %v387_v27, %v386_v4 }
 0x437   :  { %v390_v31 = vsel %vm255_vm13, %v389_v58, %v388_v63 }
 0x438   :  { %v428_v62 = vadd.f32 %v427_v59, %v390_v31 }
 0x43a   :  { %v1329_v42 = vmul.f32 -1.442695, %v428_v62 }
 0x43b   :  { %v1392_v3 = vpop.eup %1391 }
 0x43c   :  { %491 = vrot.lane.b32.xlu0 %v1392_v3, %s1574_s28  ;;  %1393 = vpow2.f32 %v1329_v42 }
 0x442   :  { %v1394_v50 = vpop.eup %1393 }
 0x443   :  { %v456_v5 = vadd.f32 1.0, %v1394_v50  ;;  %v516_v50 = vrot.slane %v1948_v51, 4 }
 0x445   :  { %1395 = vrcp.f32 %v456_v5  ;;  %v469_v1 = vand.u32 2147483648, %v456_v5  ;;  %vm463_vm0 = vweird.f32 %v456_v5  ;;  %v467_v2 = vand.u32 2147483647, %v456_v5 }
 0x447   :  { %v470_v18 = vor.u32 1.1754944e-38, %v469_v1  ;;  %vm468_vm2 = vcmp.eq.f32.partialorder %v467_v2, 8.507059e+37 }
 0x44b   :  { %v1396_v53 = vpop.eup %1395 }
 0x44c   :  { %v459_v56 = vmul.f32 %v1396_v53, %v456_v5  ;;  %vm464_vm15 = vweird.f32 %v1396_v53 }
 0x44d   :  { %vm465_vm1 = vmor %vm463_vm0, %vm464_vm15 }
 0x44e   :  { %v460_v61 = vsub.f32 1.0, %v459_v56 }
 0x450   :  { %v461_v11 = vmul.f32 %v1396_v53, %v460_v61 }
 0x452   :  { %v462_v0 = vadd.f32 %v1396_v53, %v461_v11 }
 0x454   :  { %v466_v9 = vsel %vm465_vm1, %v1396_v53, %v462_v0  ;;  %v518_v53 = vrot.slane %v1952_v57, 3 }
 0x455   :  { %v471_v6 = vsel %vm468_vm2, %v470_v18, %v466_v9 }
 0x456   :  { %v489_v3 = vmul.f32 %v471_v6, %v1959_v29 }
 0x4ae   :  { %v492_v10 = vpop.permute.xlu0 %491 }
 0x4af   :  { %v494_v7 = vmul.f32 %v492_v10, %v471_v6 }
 0x4b1   :  { %496 = vrot.lane.b32.xlu1 %v494_v7, %s1574_s28 }
 0x523   :  { %v497_v22 = vpop.permute.xlu1 %496 }
 0x524   :  { %v2001_v19 = vadd.f32 %v497_v22, %v489_v3 }
 0x526   :  { %1397 = vtanh.f32 %v2001_v19 }
 0x527   :  { %1399 = vpow2.f32 %v1330_v12 }
 0x52c   :  { %v1398_v21 = vpop.eup %1397 }
 0x52d   :  { %502 = vrot.lane.b32.xlu2 %v1398_v21, %s1574_s28  ;;  %v1400_v24 = vpop.eup %1399 }
 0x52e   :  { %v457_v15 = vadd.f32 1.0, %v1400_v24 }
 0x530   :  { %1401 = vrcp.f32 %v457_v15  ;;  %v484_v29 = vand.u32 2147483648, %v457_v15  ;;  %vm478_vm4 = vweird.f32 %v457_v15  ;;  %v482_v58 = vand.u32 2147483647, %v457_v15 }
 0x532   :  { %v485_v59 = vor.u32 1.1754944e-38, %v484_v29  ;;  %vm483_vm15 = vcmp.eq.f32.partialorder %v482_v58, 8.507059e+37 }
 0x536   :  { %v1402_v16 = vpop.eup %1401 }
 0x537   :  { %v474_v52 = vmul.f32 %v1402_v16, %v457_v15  ;;  %vm479_vm3 = vweird.f32 %v1402_v16 }
 0x538   :  { %vm480_vm14 = vmor %vm478_vm4, %vm479_vm3 }
 0x539   :  { %v475_v23 = vsub.f32 1.0, %v474_v52 }
 0x53b   :  { %v476_v27 = vmul.f32 %v1402_v16, %v475_v23 }
 0x53d   :  { %v477_v4 = vadd.f32 %v1402_v16, %v476_v27 }
 0x53f   :  { %v481_v63 = vsel %vm480_vm14, %v1402_v16, %v477_v4 }
 0x540   :  { %v486_v31 = vsel %vm483_vm15, %v485_v59, %v481_v63 }
 0x587   :  { %v503_v62 = vpop.permute.xlu2 %502 }
 0x588   :  { %v505_v20 = vmul.f32 %v503_v62, %v486_v31 }
 0x58a   :  { %1331 = vmatmul.msk.f32.vlgmr.msrb.gmra.mxu0 %vm273_vm6, %v505_v20  ;;  %1332 = vmatmul.msk.f32.vlgmr.msrb.gmra.mxu1 %vm273_vm6, %v505_v20 }
 0x58b   :  { %1063 = vmatpush.msrb.mxu0 %v1618_v33  ;;  %1083 = vmatpush.msrb.mxu1 %v1620_v34 }
 0x58d   :  { %1064 = vmatpush.msrb.mxu0 %v1622_v35  ;;  %1084 = vmatpush.msrb.mxu1 %v1626_v36  ;;  %v506_v36 = vrot.slane %v1928_v26, 2 }
 0x58f   :  { %1065 = vmatpush.msrb.mxu0 %v1628_v37  ;;  %1085 = vmatpush.msrb.mxu1 %v1630_v38  ;;  %v507_v37 = vrot.slane %v1921_v13, 1 }
 0x591   :  { %1066 = vmatpush.msrb.mxu0 %v1635_v39  ;;  %1086 = vmatpush.msrb.mxu1 %v1637_v40  ;;  %v508_v38 = vsel %vm237_vm7, %v507_v37, %v506_v36  ;;  %v510_v39 = vrot.slane %v1932_v28, 7 }
 0x592   :  { %v509_v40 = vsel %vm240_vm8, %v1926_v25, %v508_v38 }
 0x593   :  { %1067 = vmatpush.msrb.mxu0 %v1644_v44  ;;  %1087 = vmatpush.msrb.mxu1 %v1646_v45  ;;  %v512_v44 = vrot.slane %v1938_v60, 6  ;;  %v511_v45 = vsel %vm243_vm9, %v510_v39, %v509_v40 }
 0x595   :  { %1068 = vmatpush.msrb.mxu0 %v1653_v46  ;;  %1088 = vmatpush.msrb.mxu1 %v1655_v47  ;;  %v513_v42 = vsel %vm246_vm10, %v512_v44, %v511_v45  ;;  %v1479_v44 = vld [vmem:[#allocation4 + $0x70] sm:$0xff]  ;;  %v1480_v45 = vld [vmem:[#allocation4 + $0x78] sm:$0xff] }
 0x597   :  { %1069 = vmatpush.msrb.mxu0 %v1660_v48  ;;  %1089 = vmatpush.msrb.mxu1 %v1662_v49 }
 0x599   :  { %1070 = vmatpush.msrb.mxu0 %v1680_v54  ;;  %1090 = vmatpush.msrb.mxu1 %v1682_v55 }
 0x607   :  { %v576_v33 = vpop.f32.mrf.mxu1  ;;  %v556_v61 = vpop.f32.mrf.mxu0 }
 0x608   :  { %v577_v34 = vadd.f32 %v576_v33, %v1813_v14  ;;  %v514_v14 = vrot.slane %v1941_v30, 5 }
 0x60a   :  { %1403 = vtanh.f32 %v577_v34  ;;  %v515_v5 = vsel %vm249_vm11, %v514_v14, %v513_v42  ;;  %v1334_v58 = vmul.f32 -1.442695, %v577_v34  ;;  %v1481_v14 = vld [vmem:[#allocation4 + $0x60] sm:$0xff]  ;;  %v1482_v42 = vld [vmem:[#allocation4 + $0x68] sm:$0xff] }
 0x60b   :  { %v517_v56 = vsel %vm252_vm12, %v516_v50, %v515_v5  ;;  %v1483_v50 = vld [vmem:[#allocation4 + $0x50] sm:$0xff]  ;;  %v1484_v5 = vld [vmem:[#allocation4 + $0x58] sm:$0xff] }
 0x60c   :  { %v519_v11 = vsel %vm255_vm13, %v518_v53, %v517_v56  ;;  %v1485_v53 = vld [vmem:[#allocation4 + $0x40] sm:$0xff]  ;;  %v1486_v56 = vld [vmem:[#allocation4 + $0x48] sm:$0xff] }
 0x60d   :  { %v557_v0 = vadd.f32 %v556_v61, %v519_v11  ;;  %v1487_v61 = vld [vmem:[#allocation4 + $0x30] sm:$0xff]  ;;  %v1488_v11 = vld [vmem:[#allocation4 + $0x38] sm:$0xff] }
 0x60f   :  { %v1333_v1 = vmul.f32 -1.442695, %v557_v0 }
 0x610   :  { %v1404_v35 = vpop.eup %1403 }
 0x611   :  { %620 = vrot.lane.b32.xlu0 %v1404_v35, %s1574_s28  ;;  %1405 = vpow2.f32 %v1333_v1 }
 0x617   :  { %v1406_v2 = vpop.eup %1405 }
 0x618   :  { %v585_v9 = vadd.f32 1.0, %v1406_v2 }
 0x61a   :  { %1407 = vrcp.f32 %v585_v9  ;;  %v598_v22 = vand.u32 2147483648, %v585_v9  ;;  %vm592_vm1 = vweird.f32 %v585_v9  ;;  %v596_v21 = vand.u32 2147483647, %v585_v9 }
 0x61c   :  { %v599_v24 = vor.u32 1.1754944e-38, %v598_v22  ;;  %vm597_vm3 = vcmp.eq.f32.partialorder %v596_v21, 8.507059e+37 }
 0x620   :  { %v1408_v18 = vpop.eup %1407 }
 0x621   :  { %v588_v10 = vmul.f32 %v1408_v18, %v585_v9  ;;  %vm593_vm0 = vweird.f32 %v1408_v18  ;;  %v635_v9 = vrot.slane %v1928_v26, 3 }
 0x622   :  { %vm594_vm2 = vmor %vm592_vm1, %vm593_vm0 }
 0x623   :  { %v589_v6 = vsub.f32 1.0, %v588_v10  ;;  %v645_v10 = vrot.slane %v1948_v51, 5 }
 0x625   :  { %v590_v7 = vmul.f32 %v1408_v18, %v589_v6 }
 0x627   :  { %v591_v3 = vadd.f32 %v1408_v18, %v590_v7  ;;  %v647_v7 = vrot.slane %v1952_v57, 4 }
 0x629   :  { %v595_v12 = vsel %vm594_vm2, %v1408_v18, %v591_v3 }
 0x62a   :  { %v600_v16 = vsel %vm597_vm3, %v599_v24, %v595_v12 }
 0x62b   :  { %v618_v23 = vmul.f32 %v600_v16, %v2001_v19 }
 0x683   :  { %v621_v15 = vpop.permute.xlu0 %620 }
 0x684   :  { %v623_v52 = vmul.f32 %v621_v15, %v600_v16 }
 0x686   :  { %625 = vrot.lane.b32.xlu1 %v623_v52, %s1574_s28 }
 0x6f8   :  { %v626_v27 = vpop.permute.xlu1 %625 }
 0x6f9   :  { %v2042_v4 = vadd.f32 %v626_v27, %v618_v23 }
 0x6fb   :  { %1409 = vtanh.f32 %v2042_v4 }
 0x6fc   :  { %1411 = vpow2.f32 %v1334_v58 }
 0x701   :  { %v1410_v29 = vpop.eup %1409 }
 0x702   :  { %631 = vrot.lane.b32.xlu2 %v1410_v29, %s1574_s28  ;;  %v1412_v63 = vpop.eup %1411 }
 0x703   :  { %v586_v59 = vadd.f32 1.0, %v1412_v63 }
 0x705   :  { %1413 = vrcp.f32 %v586_v59  ;;  %v613_v19 = vand.u32 2147483648, %v586_v59  ;;  %vm607_vm14 = vweird.f32 %v586_v59  ;;  %v611_v36 = vand.u32 2147483647, %v586_v59 }
 0x707   :  { %v614_v38 = vor.u32 1.1754944e-38, %v613_v19  ;;  %vm612_vm0 = vcmp.eq.f32.partialorder %v611_v36, 8.507059e+37 }
 0x70b   :  { %v1414_v31 = vpop.eup %1413 }
 0x70c   :  { %v603_v62 = vmul.f32 %v1414_v31, %v586_v59  ;;  %vm608_vm4 = vweird.f32 %v1414_v31 }
 0x70d   :  { %vm609_vm15 = vmor %vm607_vm14, %vm608_vm4 }
 0x70e   :  { %v604_v20 = vsub.f32 1.0, %v603_v62 }
 0x710   :  { %v605_v33 = vmul.f32 %v1414_v31, %v604_v20 }
 0x712   :  { %v606_v35 = vadd.f32 %v1414_v31, %v605_v33 }
 0x714   :  { %v610_v37 = vsel %vm609_vm15, %v1414_v31, %v606_v35 }
 0x715   :  { %v615_v39 = vsel %vm612_vm0, %v614_v38, %v610_v37 }
 0x75c   :  { %v632_v40 = vpop.permute.xlu2 %631 }
 0x75d   :  { %v634_v34 = vmul.f32 %v632_v40, %v615_v39 }
 0x75f   :  { %1335 = vmatmul.msk.f32.vlgmr.msrb.gmra.mxu2 %vm273_vm6, %v634_v34  ;;  %1336 = vmatmul.msk.f32.vlgmr.msrb.gmra.mxu3 %vm273_vm6, %v634_v34 }
 0x760   :  { %1192 = vmatpush.msrb.mxu2 %v1479_v44  ;;  %1212 = vmatpush.msrb.mxu3 %v1480_v45 }
 0x762   :  { %1193 = vmatpush.msrb.mxu2 %v1481_v14  ;;  %1213 = vmatpush.msrb.mxu3 %v1482_v42 }
 0x764   :  { %1194 = vmatpush.msrb.mxu2 %v1483_v50  ;;  %1214 = vmatpush.msrb.mxu3 %v1484_v5 }
 0x766   :  { %1195 = vmatpush.msrb.mxu2 %v1485_v53  ;;  %1215 = vmatpush.msrb.mxu3 %v1486_v56 }
 0x768   :  { %1196 = vmatpush.msrb.mxu2 %v1487_v61  ;;  %1216 = vmatpush.msrb.mxu3 %v1488_v11 }
 0x76a   :  { %1197 = vmatpush.msrb.mxu2 %v1653_v46  ;;  %1217 = vmatpush.msrb.mxu3 %v1655_v47  ;;  %v636_v46 = vrot.slane %v1921_v13, 2  ;;  %v638_v47 = vrot.slane %v1926_v25, 1 }
 0x76c   :  { %1198 = vmatpush.msrb.mxu2 %v1660_v48  ;;  %1218 = vmatpush.msrb.mxu3 %v1662_v49  ;;  %v637_v48 = vsel %vm237_vm7, %v636_v46, %v635_v9  ;;  %v764_v46 = vrot.slane %v1928_v26, 4 }
 0x76d   :  { %v639_v49 = vsel %vm240_vm8, %v638_v47, %v637_v48  ;;  %v765_v47 = vrot.slane %v1921_v13, 3  ;;  %v767_v48 = vrot.slane %v1926_v25, 2 }
 0x76e   :  { %1199 = vmatpush.msrb.mxu2 %v1680_v54  ;;  %1219 = vmatpush.msrb.mxu3 %v1682_v55  ;;  %v641_v54 = vrot.slane %v1938_v60, 7  ;;  %v640_v55 = vsel %vm243_vm9, %v1932_v28, %v639_v49 }
 0x76f   :  { %v766_v49 = vsel %vm237_vm7, %v765_v47, %v764_v46  ;;  %v893_v46 = vrot.slane %v1928_v26, 5  ;;  %v894_v47 = vrot.slane %v1921_v13, 4 }
 0x770   :  { %v642_v18 = vsel %vm246_vm10, %v641_v54, %v640_v55  ;;  %v769_v54 = vrot.slane %v1932_v28, 1  ;;  %v768_v55 = vsel %vm240_vm8, %v767_v48, %v766_v49  ;;  %v896_v48 = vrot.slane %v1926_v25, 3 }
 0x771   :  { %v895_v49 = vsel %vm237_vm7, %v894_v47, %v893_v46  ;;  %v1023_v46 = vrot.slane %v1921_v13, 5  ;;  %v1025_v47 = vrot.slane %v1926_v25, 4 }
 0x7e2   :  { %v705_v0 = vpop.f32.mrf.mxu3  ;;  %v685_v22 = vpop.f32.mrf.mxu2 }
 0x7e3   :  { %v706_v1 = vadd.f32 %v705_v0, %v1831_v43  ;;  %v643_v43 = vrot.slane %v1941_v30, 6 }
 0x7e5   :  { %1415 = vtanh.f32 %v706_v1  ;;  %v644_v6 = vsel %vm249_vm11, %v643_v43, %v642_v18  ;;  %v1338_v39 = vmul.f32 -1.442695, %v706_v1  ;;  %v770_v43 = vsel %vm243_vm9, %v769_v54, %v768_v55 }
 0x7e6   :  { %v646_v3 = vsel %vm252_vm12, %v645_v10, %v644_v6  ;;  %v771_v18 = vsel %vm246_vm10, %v1938_v60, %v770_v43  ;;  %v774_v10 = vrot.slane %v1948_v51, 6  ;;  %v898_v54 = vrot.slane %v1932_v28, 2 }
 0x7e7   :  { %v648_v21 = vsel %vm255_vm13, %v647_v7, %v646_v3  ;;  %v776_v7 = vrot.slane %v1952_v57, 5  ;;  %v897_v55 = vsel %vm240_vm8, %v896_v48, %v895_v49  ;;  %v900_v43 = vrot.slane %v1938_v60, 1 }
 0x7e8   :  { %v686_v12 = vadd.f32 %v685_v22, %v648_v21  ;;  %v1027_v49 = vrot.slane %v1932_v28, 3 }
 0x7ea   :  { %v1337_v24 = vmul.f32 -1.442695, %v686_v12 }
 0x7eb   :  { %v1416_v2 = vpop.eup %1415 }
 0x7ec   :  { %749 = vrot.lane.b32.xlu0 %v1416_v2, %s1574_s28  ;;  %1417 = vpow2.f32 %v1337_v24 }
 0x7f2   :  { %v1418_v15 = vpop.eup %1417 }
 0x7f3   :  { %v714_v16 = vadd.f32 1.0, %v1418_v15 }
 0x7f5   :  { %1419 = vrcp.f32 %v714_v16  ;;  %v727_v63 = vand.u32 2147483648, %v714_v16  ;;  %vm721_vm2 = vweird.f32 %v714_v16  ;;  %v725_v59 = vand.u32 2147483647, %v714_v16 }
 0x7f7   :  { %v728_v62 = vor.u32 1.1754944e-38, %v727_v63  ;;  %vm726_vm4 = vcmp.eq.f32.partialorder %v725_v59, 8.507059e+37 }
 0x7fb   :  { %v1420_v52 = vpop.eup %1419 }
 0x7fc   :  { %v717_v23 = vmul.f32 %v1420_v52, %v714_v16  ;;  %vm722_vm1 = vweird.f32 %v1420_v52 }
 0x7fd   :  { %vm723_vm3 = vmor %vm721_vm2, %vm722_vm1 }
 0x7fe   :  { %v718_v27 = vsub.f32 1.0, %v717_v23 }
 0x800   :  { %v719_v29 = vmul.f32 %v1420_v52, %v718_v27 }
 0x802   :  { %v720_v58 = vadd.f32 %v1420_v52, %v719_v29 }
 0x804   :  { %v724_v31 = vsel %vm723_vm3, %v1420_v52, %v720_v58 }
 0x805   :  { %v729_v33 = vsel %vm726_vm4, %v728_v62, %v724_v31 }
 0x806   :  { %v747_v19 = vmul.f32 %v729_v33, %v2042_v4 }
 0x85e   :  { %v750_v20 = vpop.permute.xlu0 %749 }
 0x85f   :  { %v752_v35 = vmul.f32 %v750_v20, %v729_v33 }
 0x861   :  { %754 = vrot.lane.b32.xlu1 %v752_v35, %s1574_s28 }
 0x8d3   :  { %v755_v36 = vpop.permute.xlu1 %754 }
 0x8d4   :  { %v2073_v37 = vadd.f32 %v755_v36, %v747_v19 }
 0x8d6   :  { %1421 = vtanh.f32 %v2073_v37 }
 0x8d7   :  { %1423 = vpow2.f32 %v1338_v39 }
 0x8dc   :  { %v1422_v38 = vpop.eup %1421 }
 0x8dd   :  { %760 = vrot.lane.b32.xlu2 %v1422_v38, %s1574_s28  ;;  %v1424_v40 = vpop.eup %1423 }
 0x8de   :  { %v715_v34 = vadd.f32 1.0, %v1424_v40 }
 0x8e0   :  { %1425 = vrcp.f32 %v715_v34  ;;  %v742_v4 = vand.u32 2147483648, %v715_v34  ;;  %vm736_vm15 = vweird.f32 %v715_v34  ;;  %v740_v5 = vand.u32 2147483647, %v715_v34 }
 0x8e2   :  { %v743_v56 = vor.u32 1.1754944e-38, %v742_v4  ;;  %vm741_vm1 = vcmp.eq.f32.partialorder %v740_v5, 8.507059e+37 }
 0x8e6   :  { %v1426_v44 = vpop.eup %1425 }
 0x8e7   :  { %v732_v45 = vmul.f32 %v1426_v44, %v715_v34  ;;  %vm737_vm14 = vweird.f32 %v1426_v44 }
 0x8e8   :  { %vm738_vm0 = vmor %vm736_vm15, %vm737_vm14 }
 0x8e9   :  { %v733_v14 = vsub.f32 1.0, %v732_v45 }
 0x8eb   :  { %v734_v42 = vmul.f32 %v1426_v44, %v733_v14 }
 0x8ed   :  { %v735_v50 = vadd.f32 %v1426_v44, %v734_v42 }
 0x8ef   :  { %v739_v53 = vsel %vm738_vm0, %v1426_v44, %v735_v50 }
 0x8f0   :  { %v744_v61 = vsel %vm741_vm1, %v743_v56, %v739_v53 }
 0x937   :  { %v761_v11 = vpop.permute.xlu2 %760 }
 0x938   :  { %v763_v0 = vmul.f32 %v761_v11, %v744_v61 }
 0x93a   :  { %1339 = vmatmul.msk.f32.vlgmr.msra.gmra.mxu0 %vm273_vm6, %v763_v0  ;;  %1340 = vmatmul.msk.f32.vlgmr.msra.gmra.mxu1 %vm273_vm6, %v763_v0 }
 0x9b7   :  { %v834_v1 = vpop.f32.mrf.mxu1  ;;  %v814_v22 = vpop.f32.mrf.mxu0 }
 0x9b8   :  { %v835_v2 = vadd.f32 %v834_v1, %v1851_v17  ;;  %v772_v17 = vrot.slane %v1941_v30, 7 }
 0x9ba   :  { %1427 = vtanh.f32 %v835_v2  ;;  %v773_v6 = vsel %vm249_vm11, %v772_v17, %v771_v18  ;;  %v1342_v40 = vmul.f32 -1.442695, %v835_v2  ;;  %v903_v18 = vrot.slane %v1948_v51, 7 }
 0x9bb   :  { %v775_v3 = vsel %vm252_vm12, %v774_v10, %v773_v6  ;;  %v905_v6 = vrot.slane %v1952_v57, 6 }
 0x9bc   :  { %v777_v21 = vsel %vm255_vm13, %v776_v7, %v775_v3 }
 0x9bd   :  { %v815_v12 = vadd.f32 %v814_v22, %v777_v21 }
 0x9bf   :  { %v1341_v24 = vmul.f32 -1.442695, %v815_v12 }
 0x9c0   :  { %v1428_v9 = vpop.eup %1427 }
 0x9c1   :  { %878 = vrot.lane.b32.xlu0 %v1428_v9, %s1574_s28  ;;  %1429 = vpow2.f32 %v1341_v24 }
 0x9c7   :  { %v1430_v15 = vpop.eup %1429 }
 0x9c8   :  { %v843_v16 = vadd.f32 1.0, %v1430_v15 }
 0x9ca   :  { %1431 = vrcp.f32 %v843_v16  ;;  %v856_v63 = vand.u32 2147483648, %v843_v16  ;;  %vm850_vm3 = vweird.f32 %v843_v16  ;;  %v854_v59 = vand.u32 2147483647, %v843_v16 }
 0x9cc   :  { %v857_v62 = vor.u32 1.1754944e-38, %v856_v63  ;;  %vm855_vm14 = vcmp.eq.f32.partialorder %v854_v59, 8.507059e+37 }
 0x9d0   :  { %v1432_v52 = vpop.eup %1431 }
 0x9d1   :  { %v846_v23 = vmul.f32 %v1432_v52, %v843_v16  ;;  %vm851_vm2 = vweird.f32 %v1432_v52 }
 0x9d2   :  { %vm852_vm4 = vmor %vm850_vm3, %vm851_vm2 }
 0x9d3   :  { %v847_v27 = vsub.f32 1.0, %v846_v23 }
 0x9d5   :  { %v848_v29 = vmul.f32 %v1432_v52, %v847_v27 }
 0x9d7   :  { %v849_v58 = vadd.f32 %v1432_v52, %v848_v29 }
 0x9d9   :  { %v853_v31 = vsel %vm852_vm4, %v1432_v52, %v849_v58 }
 0x9da   :  { %v858_v33 = vsel %vm855_vm14, %v857_v62, %v853_v31 }
 0x9db   :  { %v876_v19 = vmul.f32 %v858_v33, %v2073_v37 }
 0xa33   :  { %v879_v20 = vpop.permute.xlu0 %878 }
 0xa34   :  { %v881_v35 = vmul.f32 %v879_v20, %v858_v33 }
 0xa36   :  { %883 = vrot.lane.b32.xlu1 %v881_v35, %s1574_s28 }
 0xaa8   :  { %v884_v36 = vpop.permute.xlu1 %883 }
 0xaa9   :  { %v2098_v38 = vadd.f32 %v884_v36, %v876_v19 }
 0xaab   :  { %1433 = vtanh.f32 %v2098_v38 }
 0xaac   :  { %1435 = vpow2.f32 %v1342_v40 }
 0xab1   :  { %v1434_v39 = vpop.eup %1433 }
 0xab2   :  { %889 = vrot.lane.b32.xlu2 %v1434_v39, %s1574_s28  ;;  %v1436_v34 = vpop.eup %1435 }
 0xab3   :  { %v844_v44 = vadd.f32 1.0, %v1436_v34 }
 0xab5   :  { %1437 = vrcp.f32 %v844_v44  ;;  %v871_v37 = vand.u32 2147483648, %v844_v44  ;;  %vm865_vm0 = vweird.f32 %v844_v44  ;;  %v869_v5 = vand.u32 2147483647, %v844_v44 }
 0xab7   :  { %v872_v56 = vor.u32 1.1754944e-38, %v871_v37  ;;  %vm870_vm2 = vcmp.eq.f32.partialorder %v869_v5, 8.507059e+37 }
 0xabb   :  { %v1438_v45 = vpop.eup %1437 }
 0xabc   :  { %v861_v14 = vmul.f32 %v1438_v45, %v844_v44  ;;  %vm866_vm15 = vweird.f32 %v1438_v45 }
 0xabd   :  { %vm867_vm1 = vmor %vm865_vm0, %vm866_vm15 }
 0xabe   :  { %v862_v42 = vsub.f32 1.0, %v861_v14 }
 0xac0   :  { %v863_v50 = vmul.f32 %v1438_v45, %v862_v42 }
 0xac2   :  { %v864_v4 = vadd.f32 %v1438_v45, %v863_v50 }
 0xac4   :  { %v868_v53 = vsel %vm867_vm1, %v1438_v45, %v864_v4 }
 0xac5   :  { %v873_v61 = vsel %vm870_vm2, %v872_v56, %v868_v53 }
 0xb0c   :  { %v890_v11 = vpop.permute.xlu2 %889 }
 0xb0d   :  { %v892_v0 = vmul.f32 %v890_v11, %v873_v61 }
 0xb0f   :  { %1343 = vmatmul.msk.f32.vlgmr.msra.gmra.mxu2 %vm273_vm6, %v892_v0  ;;  %1344 = vmatmul.msk.f32.vlgmr.msra.gmra.mxu3 %vm273_vm6, %v892_v0 }
 0xb92   :  { %v963_v1 = vpop.f32.mrf.mxu3  ;;  %v943_v3 = vpop.f32.mrf.mxu2 }
 0xb93   :  { %v964_v2 = vadd.f32 %v963_v1, %v1864_v41  ;;  %v899_v41 = vsel %vm243_vm9, %v898_v54, %v897_v55  ;;  %v1029_v55 = vrot.slane %v1938_v60, 2 }
 0xb94   :  { %v901_v17 = vsel %vm246_vm10, %v900_v43, %v899_v41  ;;  %v1031_v43 = vrot.slane %v1941_v30, 1 }
 0xb95   :  { %1439 = vtanh.f32 %v964_v2  ;;  %v902_v10 = vsel %vm249_vm11, %v1941_v30, %v901_v17  ;;  %v1346_v40 = vmul.f32 -1.442695, %v964_v2 }
 0xb96   :  { %v904_v7 = vsel %vm252_vm12, %v903_v18, %v902_v10  ;;  %v1034_v18 = vrot.slane %v1952_v57, 7 }
 0xb97   :  { %v906_v22 = vsel %vm255_vm13, %v905_v6, %v904_v7 }
 0xb98   :  { %v944_v21 = vadd.f32 %v943_v3, %v906_v22 }
 0xb9a   :  { %v1345_v12 = vmul.f32 -1.442695, %v944_v21 }
 0xb9b   :  { %v1440_v9 = vpop.eup %1439 }
 0xb9c   :  { %1007 = vrot.lane.b32.xlu0 %v1440_v9, %s1574_s28  ;;  %1441 = vpow2.f32 %v1345_v12  ;;  %v1022_v9 = vrot.slane %v1928_v26, 6 }
 0xb9e   :  { %v1024_v48 = vsel %vm237_vm7, %v1023_v46, %v1022_v9  ;;  %v1154_v9 = vrot.slane %v1926_v25, 5 }
 0xb9f   :  { %v1026_v54 = vsel %vm240_vm8, %v1025_v47, %v1024_v48  ;;  %v1156_v47 = vrot.slane %v1932_v28, 4 }
 0xba2   :  { %v1442_v24 = vpop.eup %1441 }
 0xba3   :  { %v972_v15 = vadd.f32 1.0, %v1442_v24 }
 0xba5   :  { %1443 = vrcp.f32 %v972_v15  ;;  %v985_v58 = vand.u32 2147483648, %v972_v15  ;;  %vm979_vm4 = vweird.f32 %v972_v15  ;;  %v983_v63 = vand.u32 2147483647, %v972_v15 }
 0xba7   :  { %v986_v31 = vor.u32 1.1754944e-38, %v985_v58  ;;  %vm984_vm15 = vcmp.eq.f32.partialorder %v983_v63, 8.507059e+37 }
 0xbab   :  { %v1444_v16 = vpop.eup %1443 }
 0xbac   :  { %v975_v52 = vmul.f32 %v1444_v16, %v972_v15  ;;  %vm980_vm3 = vweird.f32 %v1444_v16 }
 0xbad   :  { %vm981_vm14 = vmor %vm979_vm4, %vm980_vm3 }
 0xbae   :  { %v976_v23 = vsub.f32 1.0, %v975_v52 }
 0xbb0   :  { %v977_v27 = vmul.f32 %v1444_v16, %v976_v23 }
 0xbb2   :  { %v978_v29 = vadd.f32 %v1444_v16, %v977_v27 }
 0xbb4   :  { %v982_v59 = vsel %vm981_vm14, %v1444_v16, %v978_v29 }
 0xbb5   :  { %v987_v20 = vsel %vm984_vm15, %v986_v31, %v982_v59 }
 0xbb6   :  { %v1005_v35 = vmul.f32 %v987_v20, %v2098_v38 }
 0xc0e   :  { %v1008_v62 = vpop.permute.xlu0 %1007 }
 0xc0f   :  { %v1010_v33 = vmul.f32 %v1008_v62, %v987_v20 }
 0xc11   :  { %1012 = vrot.lane.b32.xlu1 %v1010_v33, %s1574_s28 }
 0xc83   :  { %v1013_v19 = vpop.permute.xlu1 %1012 }
 0xc84   :  { %v2123_v36 = vadd.f32 %v1013_v19, %v1005_v35 }
 0xc86   :  { %1445 = vtanh.f32 %v2123_v36 }
 0xc87   :  { %1447 = vpow2.f32 %v1346_v40 }
 0xc8c   :  { %v1446_v39 = vpop.eup %1445 }
 0xc8d   :  { %1018 = vrot.lane.b32.xlu2 %v1446_v39, %s1574_s28  ;;  %v1448_v34 = vpop.eup %1447 }
 0xc8e   :  { %v973_v44 = vadd.f32 1.0, %v1448_v34 }
 0xc90   :  { %1449 = vrcp.f32 %v973_v44  ;;  %v1000_v38 = vand.u32 2147483648, %v973_v44  ;;  %vm994_vm1 = vweird.f32 %v973_v44  ;;  %v998_v37 = vand.u32 2147483647, %v973_v44 }
 0xc92   :  { %v1001_v53 = vor.u32 1.1754944e-38, %v1000_v38  ;;  %vm999_vm3 = vcmp.eq.f32.partialorder %v998_v37, 8.507059e+37 }
 0xc96   :  { %v1450_v45 = vpop.eup %1449 }
 0xc97   :  { %v990_v14 = vmul.f32 %v1450_v45, %v973_v44  ;;  %vm995_vm0 = vweird.f32 %v1450_v45 }
 0xc98   :  { %vm996_vm2 = vmor %vm994_vm1, %vm995_vm0 }
 0xc99   :  { %v991_v42 = vsub.f32 1.0, %v990_v14 }
 0xc9b   :  { %v992_v50 = vmul.f32 %v1450_v45, %v991_v42 }
 0xc9d   :  { %v993_v4 = vadd.f32 %v1450_v45, %v992_v50 }
 0xc9f   :  { %v997_v5 = vsel %vm996_vm2, %v1450_v45, %v993_v4 }
 0xca0   :  { %v1002_v56 = vsel %vm999_vm3, %v1001_v53, %v997_v5 }
 0xce7   :  { %v1019_v61 = vpop.permute.xlu2 %1018 }
 0xce8   :  { %v1021_v11 = vmul.f32 %v1019_v61, %v1002_v56 }
 0xcea   :  { %1347 = vmatmul.msk.f32.vlgmr.msrb.gmra.mxu0 %vm273_vm6, %v1021_v11  ;;  %1348 = vmatmul.msk.f32.vlgmr.msrb.gmra.mxu1 %vm273_vm6, %v1021_v11 }
 0xd67   :  { %v1092_v0 = vpop.f32.mrf.mxu1  ;;  %v1072_v6 = vpop.f32.mrf.mxu0 }
 0xd68   :  { %v1093_v1 = vadd.f32 %v1092_v0, %v1880_v8  ;;  %v1028_v8 = vsel %vm243_vm9, %v1027_v49, %v1026_v54  ;;  %v1158_v49 = vrot.slane %v1938_v60, 3  ;;  %v1160_v54 = vrot.slane %v1941_v30, 2 }
 0xd69   :  { %v1030_v41 = vsel %vm246_vm10, %v1029_v55, %v1028_v8 }
 0xd6a   :  { %1451 = vtanh.f32 %v1093_v1  ;;  %v1032_v17 = vsel %vm249_vm11, %v1031_v43, %v1030_v41  ;;  %v1350_v39 = vmul.f32 -1.442695, %v1093_v1  ;;  %v1151_v1 = vrot.slane %v1928_v26, 7 }
 0xd6b   :  { %v1033_v10 = vsel %vm252_vm12, %v1948_v51, %v1032_v17  ;;  %v1162_v26 = vrot.slane %v1948_v51, 1 }
 0xd6c   :  { %v1035_v7 = vsel %vm255_vm13, %v1034_v18, %v1033_v10  ;;  %v1489_v18 = vld [vmem:[#allocation6] sm:$0xff] }
 0xd6d   :  { %v1073_v3 = vadd.f32 %v1072_v6, %v1035_v7  ;;  %v1280_v10 = vperm.slane %v1489_v18, 4 }
 0xd6f   :  { %v1349_v22 = vmul.f32 -1.442695, %v1073_v3 }
 0xd70   :  { %v1452_v2 = vpop.eup %1451 }
 0xd71   :  { %1136 = vrot.lane.b32.xlu0 %v1452_v2, %s1574_s28  ;;  %1453 = vpow2.f32 %v1349_v22  ;;  %v1152_v2 = vrot.slane %v1921_v13, 6 }
 0xd73   :  { %v1153_v46 = vsel %vm237_vm7, %v1152_v2, %v1151_v1 }
 0xd74   :  { %v1155_v48 = vsel %vm240_vm8, %v1154_v9, %v1153_v46 }
 0xd77   :  { %v1454_v21 = vpop.eup %1453 }
 0xd78   :  { %v1101_v12 = vadd.f32 1.0, %v1454_v21 }
 0xd7a   :  { %1455 = vrcp.f32 %v1101_v12  ;;  %v1114_v27 = vand.u32 2147483648, %v1101_v12  ;;  %vm1108_vm14 = vweird.f32 %v1101_v12  ;;  %v1112_v29 = vand.u32 2147483647, %v1101_v12 }
 0xd7c   :  { %v1115_v63 = vor.u32 1.1754944e-38, %v1114_v27  ;;  %vm1113_vm0 = vcmp.eq.f32.partialorder %v1112_v29, 8.507059e+37 }
 0xd80   :  { %v1456_v24 = vpop.eup %1455 }
 0xd81   :  { %v1104_v15 = vmul.f32 %v1456_v24, %v1101_v12  ;;  %vm1109_vm4 = vweird.f32 %v1456_v24 }
 0xd82   :  { %vm1110_vm15 = vmor %vm1108_vm14, %vm1109_vm4 }
 0xd83   :  { %v1105_v16 = vsub.f32 1.0, %v1104_v15 }
 0xd85   :  { %v1106_v52 = vmul.f32 %v1456_v24, %v1105_v16 }
 0xd87   :  { %v1107_v23 = vadd.f32 %v1456_v24, %v1106_v52 }
 0xd89   :  { %v1111_v58 = vsel %vm1110_vm15, %v1456_v24, %v1107_v23 }
 0xd8a   :  { %v1116_v31 = vsel %vm1113_vm0, %v1115_v63, %v1111_v58  ;;  %vm1314_vm0 = vcmask 7168  }
 0xd8b   :  { %v1134_v20 = vmul.f32 %v1116_v31, %v2123_v36 }
 0xde3   :  { %v1137_v59 = vpop.permute.xlu0 %1136 }
 0xde4   :  { %v1139_v62 = vmul.f32 %v1137_v59, %v1116_v31 }
 0xde6   :  { %1141 = vrot.lane.b32.xlu1 %v1139_v62, %s1574_s28 }
 0xe58   :  { %v1142_v33 = vpop.permute.xlu1 %1141 }
 0xe59   :  { %v2148_v35 = vadd.f32 %v1142_v33, %v1134_v20 }
 0xe5b   :  { %1457 = vtanh.f32 %v2148_v35 }
 0xe5c   :  { %1459 = vpow2.f32 %v1350_v39 }
 0xe61   :  { %v1458_v19 = vpop.eup %1457 }
 0xe62   :  { %1147 = vrot.lane.b32.xlu2 %v1458_v19, %s1574_s28  ;;  %v1460_v40 = vpop.eup %1459 }
 0xe63   :  { %v1102_v34 = vadd.f32 1.0, %v1460_v40 }
 0xe65   :  { %1461 = vrcp.f32 %v1102_v34  ;;  %v1129_v36 = vand.u32 2147483648, %v1102_v34  ;;  %vm1123_vm2 = vweird.f32 %v1102_v34  ;;  %v1127_v4 = vand.u32 2147483647, %v1102_v34 }
 0xe67   :  { %v1130_v37 = vor.u32 1.1754944e-38, %v1129_v36  ;;  %vm1128_vm4 = vcmp.eq.f32.partialorder %v1127_v4, 8.507059e+37 }
 0xe6b   :  { %v1462_v44 = vpop.eup %1461 }
 0xe6c   :  { %v1119_v45 = vmul.f32 %v1462_v44, %v1102_v34  ;;  %vm1124_vm1 = vweird.f32 %v1462_v44 }
 0xe6d   :  { %vm1125_vm3 = vmor %vm1123_vm2, %vm1124_vm1 }
 0xe6e   :  { %v1120_v14 = vsub.f32 1.0, %v1119_v45 }
 0xe70   :  { %v1121_v42 = vmul.f32 %v1462_v44, %v1120_v14 }
 0xe72   :  { %v1122_v50 = vadd.f32 %v1462_v44, %v1121_v42 }
 0xe74   :  { %v1126_v38 = vsel %vm1125_vm3, %v1462_v44, %v1122_v50 }
 0xe75   :  { %v1131_v5 = vsel %vm1128_vm4, %v1130_v37, %v1126_v38  ;;  %v1293_v38 = vperm.slane %v1489_v18, 5 }
 0xebc   :  { %v1148_v53 = vpop.permute.xlu2 %1147 }
 0xebd   :  { %v1150_v56 = vmul.f32 %v1148_v53, %v1131_v5 }
 0xebf   :  { %1351 = vmatmul.msk.f32.vlgmr.msrb.gmra.mxu2 %vm273_vm6, %v1150_v56  ;;  %1352 = vmatmul.msk.f32.vlgmr.msrb.gmra.mxu3 %vm273_vm6, %v1150_v56 }
 0xf42   :  { %v1221_v61 = vpop.f32.mrf.mxu3  ;;  %v1201_v8 = vpop.f32.mrf.mxu2 }
 0xf43   :  { %v1222_v11 = vadd.f32 %v1221_v61, %v1896_v32  ;;  %v1157_v32 = vsel %vm243_vm9, %v1156_v47, %v1155_v48 }
 0xf44   :  { %v1159_v55 = vsel %vm246_vm10, %v1158_v49, %v1157_v32 }
 0xf45   :  { %1463 = vtanh.f32 %v1222_v11  ;;  %v1161_v13 = vsel %vm249_vm11, %v1160_v54, %v1159_v55  ;;  %v1354_v58 = vmul.f32 -1.442695, %v1222_v11 }
 0xf46   :  { %v1163_v25 = vsel %vm252_vm12, %v1162_v26, %v1161_v13 }
 0xf47   :  { %v1164_v28 = vsel %vm255_vm13, %v1952_v57, %v1163_v25 }
 0xf48   :  { %v1202_v43 = vadd.f32 %v1201_v8, %v1164_v28 }
 0xf4a   :  { %v1353_v41 = vmul.f32 -1.442695, %v1202_v43 }
 0xf4b   :  { %v1464_v0 = vpop.eup %1463 }
 0xf4c   :  { %1265 = vrot.lane.b32.xlu0 %v1464_v0, %s1574_s28  ;;  %1465 = vpow2.f32 %v1353_v41 }
 0xf52   :  { %v1466_v60 = vpop.eup %1465 }
 0xf53   :  { %v1230_v17 = vadd.f32 1.0, %v1466_v60 }
 0xf54   :  { %1282 = vrot.lane.b32.xlu0 %v1280_v10, %s1573_s2 }
 0xf55   :  { %1467 = vrcp.f32 %v1230_v17  ;;  %v1243_v22 = vand.u32 2147483648, %v1230_v17  ;;  %vm1237_vm7 = vweird.f32 %v1230_v17  ;;  %v1241_v21 = vand.u32 2147483647, %v1230_v17 }
 0xf57   :  { %v1244_v12 = vor.u32 1.1754944e-38, %v1243_v22  ;;  %vm1242_vm9 = vcmp.eq.f32.partialorder %v1241_v21, 8.507059e+37 }
 0xf5b   :  { %v1468_v30 = vpop.eup %1467 }
 0xf5c   :  { %v1233_v51 = vmul.f32 %v1468_v30, %v1230_v17  ;;  %vm1238_vm6 = vweird.f32 %v1468_v30 }
 0xf5d   :  { %vm1239_vm8 = vmor %vm1237_vm7, %vm1238_vm6 }
 0xf5e   :  { %v1234_v6 = vsub.f32 1.0, %v1233_v51 }
 0xf60   :  { %v1235_v7 = vmul.f32 %v1468_v30, %v1234_v6 }
 0xf62   :  { %v1236_v3 = vadd.f32 %v1468_v30, %v1235_v7 }
 0xf64   :  { %v1240_v57 = vsel %vm1239_vm8, %v1468_v30, %v1236_v3 }
 0xf65   :  { %v1245_v15 = vsel %vm1242_vm9, %v1244_v12, %v1240_v57 }
 0xf66   :  { %v1263_v52 = vmul.f32 %v1245_v15, %v2148_v35 }
 0xfbe   :  { %v1266_v24 = vpop.permute.xlu0 %1265 }
 0xfbf   :  { %v1268_v16 = vmul.f32 %v1266_v24, %v1245_v15 }
 0xfc1   :  { %1270 = vrot.lane.b32.xlu1 %v1268_v16, %s1574_s28 }
 0xfc6   :  { %v1283_v14 = vpop.permute.xlu0 %1282 }
0x1033   :  { %v1271_v23 = vpop.permute.xlu1 %1270 }
0x1034   :  { %v1273_v27 = vadd.f32 %v1271_v23, %v1263_v52 }
0x1036   :  { %1469 = vtanh.f32 %v1273_v27 }
0x1037   :  { %1471 = vpow2.f32 %v1354_v58 }
0x103c   :  { %v1470_v29 = vpop.eup %1469 }
0x103d   :  { %1276 = vrot.lane.b32.xlu2 %v1470_v29, %s1574_s28  ;;  %v1472_v63 = vpop.eup %1471 }
0x103e   :  { %v1231_v59 = vadd.f32 1.0, %v1472_v63 }
0x1040   :  { %1473 = vrcp.f32 %v1231_v59  ;;  %v1258_v39 = vand.u32 2147483648, %v1231_v59  ;;  %vm1252_vm11 = vweird.f32 %v1231_v59  ;;  %v1256_v35 = vand.u32 2147483647, %v1231_v59 }
0x1042   :  { %v1259_v34 = vor.u32 1.1754944e-38, %v1258_v39  ;;  %vm1257_vm13 = vcmp.eq.f32.partialorder %v1256_v35, 8.507059e+37 }
0x1046   :  { %v1474_v31 = vpop.eup %1473 }
0x1047   :  { %v1248_v62 = vmul.f32 %v1474_v31, %v1231_v59  ;;  %vm1253_vm10 = vweird.f32 %v1474_v31 }
0x1048   :  { %vm1254_vm12 = vmor %vm1252_vm11, %vm1253_vm10 }
0x1049   :  { %v1249_v20 = vsub.f32 1.0, %v1248_v62 }
0x104b   :  { %v1250_v33 = vmul.f32 %v1474_v31, %v1249_v20 }
0x104d   :  { %v1251_v19 = vadd.f32 %v1474_v31, %v1250_v33 }
0x104f   :  { %v1255_v40 = vsel %vm1254_vm12, %v1474_v31, %v1251_v19 }
0x1050   :  { %v1260_v44 = vsel %vm1257_vm13, %v1259_v34, %v1255_v40 }
0x1097   :  { %v1277_v45 = vpop.permute.xlu2 %1276 }
0x1098   :  { %v1279_v42 = vmul.f32 %v1277_v45, %v1260_v44 }
0x109a   :  { %v1285_v50 = vmul.f32 %v1283_v14, %v1279_v42 }
0x109c   :  { %1287 = vrot.lane.b32.xlu1 %v1285_v50, %s1575_s29 }
0x110e   :  { %v1288_v36 = vpop.permute.xlu1 %1287 }
0x110f   :  { %v1290_v4 = vsel %vm217_vm5, %v1288_v36, 0.0 }
0x1110   :  { %1291 = vadd.xlane.f32.xlu2 %v1290_v4 }
0x1183   :  { %v1292_v37 = vpop.xlane.xlu2 %1291 }
0x1184   :  { %v1294_v5 = vadd.f32 %v1293_v38, %v1292_v37 }
0x1186   :  { %v1355_v53 = vmul.f32 -1.442695, %v1294_v5 }
0x1188   :  { %1475 = vpow2.f32 %v1355_v53 }
0x118e   :  { %v1476_v56 = vpop.eup %1475 }
0x118f   :  { %v1298_v61 = vadd.f32 1.0, %v1476_v56 }
0x1191   :  { %1477 = vrcp.f32 %v1298_v61  ;;  %v1310_v2 = vand.u32 2147483648, %v1298_v61  ;;  %v1308_v46 = vand.u32 2147483647, %v1298_v61  ;;  %vm1304_vm15 = vweird.f32 %v1298_v61 }
0x1193   :  { %v1311_v48 = vor.u32 1.1754944e-38, %v1310_v2  ;;  %vm1309_vm1 = vcmp.eq.f32.partialorder %v1308_v46, 8.507059e+37 }
0x1197   :  { %v1478_v11 = vpop.eup %1477 }
0x1198   :  { %v1300_v0 = vmul.f32 %v1478_v11, %v1298_v61  ;;  %vm1305_vm14 = vweird.f32 %v1478_v11 }
0x1199   :  { %vm1306_vm5 = vmor %vm1304_vm15, %vm1305_vm14 }
0x119a   :  { %v1301_v1 = vsub.f32 1.0, %v1300_v0 }
0x119c   :  { %v1302_v9 = vmul.f32 %v1478_v11, %v1301_v1 }
0x119e   :  { %v1303_v47 = vadd.f32 %v1478_v11, %v1302_v9 }
0x11a0   :  { %v1307_v49 = vsel %vm1306_vm5, %v1478_v11, %v1303_v47 }
0x11a1   :  { %v1312_v32 = vsel %vm1309_vm1, %v1311_v48, %v1307_v49 }
0x11a2   :  { %1315 = vst.msk [vmem:[%s2182_s3] sm:$0xff] %vm1314_vm0, %v1312_v32 }
0x11a3   :  { %1320 = vsyncpa [#allocation3], 1 }
0x11a4   :  { %1321 = vsyncpa [#allocation5], 1 }

</bundles_post_ra>
